<compile_context>
chip_gen: v7x
topology: tpu7x:2x2x1
jax: 0.10.0
libtpu: 0.0.40
codegen_flags: <defaults>
</compile_context>

<pallas_src>
import math

import jax
import jax.numpy as jnp
from jax.experimental import pallas as pl
from jax.experimental.pallas import tpu as pltpu

# ---- static model configuration (MiniGrid 7x7x3 obs, 7 actions) -------------
B = 2
IMG_H = IMG_W = 7
CIN = 3
N_ACTIONS = 7
EMBED = ((IMG_H - 1) // 2 - 2) * ((IMG_W - 1) // 2 - 2) * 64    # = 64
LN_EPS = 1e-5
LOG_2PI = math.log(2.0 * math.pi)

# conv spatial bookkeeping (all static)
OH1, OW1 = IMG_H - 1, IMG_W - 1          # 6, 6   conv1 output
PH, PW = OH1 // 2, OW1 // 2              # 3, 3   after 2x2 max-pool
OH2, OW2 = PH - 1, PW - 1                # 2, 2   conv2 output
K1 = 4 * CIN                             # 12     conv1 im2col columns
Q_ROWS = PH * PW * B                     # 18     valid rows per conv1 quarter
QP = 24                                  # padded quarter rows (8-aligned)
P1_ROWS = 4 * QP                         # 96     conv1 im2col rows (padded)

# ---- packed parameter slab layout (rows x 128 lanes, f32) --------------------
R_FC1 = 0        # (64,128)  [actor_fc1.W^T | critic_fc1.W^T]
R_W3 = 64        # (128,64)  conv3 im2col weight
R_FC2 = 192      # (128,8)   block-diagonal [actor_fc2 | critic_fc2]
R_W2 = 320       # (64,32)   conv2 im2col weight
R_W1 = 384       # (12,16)   conv1 im2col weight
R_VEC = 400      # (8,128)   biases + LayerNorm params (layout in make_params)
W_ROWS = 408

# ---- single lane-dense output slab -------------------------------------------
OUT_ROWS, OUT_COLS = 8, 128
VAL_COL = N_ACTIONS                      # value at column 7, rows [0, B)

# Set True on v6e/v7x to feed bf16 operands to the MXU (f32 accumulate) AFTER
# validating MDL / LayerNorm tolerances.  Keep False on v5e (no bf16 VPU path)
# and for bit-level f32 parity with the PyTorch reference.
MXU_BF16 = False


def _dot(a, b):
    if MXU_BF16:
        a = a.astype(jnp.bfloat16)
        b = b.astype(jnp.bfloat16)
    return jnp.dot(a, b, preferred_element_type=jnp.float32)


def _sum_all(x):
    return jnp.sum(jnp.sum(x, axis=1, keepdims=True), axis=0, keepdims=True)


def _max_all(x):
    return jnp.max(jnp.max(x, axis=1, keepdims=True), axis=0, keepdims=True)


def _mdl(x, n):
    """getHistoryStats (history=None branch) + getMDL(RN=True).

    Returns the l_nml-scaled tensor and the (1,1)-shaped stats
    [mean, std(unbiased), numel, COMP, l_nml]."""
    nf = float(n)
    mean = _sum_all(x) / nf
    cen = x - mean
    var_u = _sum_all(cen * cen) / (nf - 1.0)          # unbiased, like torch.std
    std = jnp.sqrt(var_u)
    # log N(x | mean, std); degenerates (inf/nan) if var_u == 0, exactly like
    # the torch reference (Normal with scale 0).
    logp = -0.5 * (cen * cen) / var_u - 0.5 * jnp.log(var_u) - 0.5 * LOG_2PI
    lp_max = _max_all(logp)
    sum_p = lp_max + jnp.log(_sum_all(jnp.exp(logp - lp_max)))
    # COMP = logaddexp(COMP_in = 0, sum_p): both torch branches reduce to this
    # when the history stack is None; computed in max-shifted (stable) form.
    m = jnp.maximum(sum_p, 0.0)
    comp = m + jnp.log(jnp.exp(sum_p - m) + jnp.exp(-m))
    l_nml = comp - sum_p
    numel = jnp.full((1, 1), nf, jnp.float32)
    return l_nml * x, (mean, std, numel, comp, l_nml)


def _layernorm(x, g, b):
    mu = jnp.mean(x, axis=-1, keepdims=True)
    var = jnp.mean((x - mu) ** 2, axis=-1, keepdims=True)   # biased, like nn.LayerNorm
    return (x - mu) * jax.lax.rsqrt(var + LN_EPS) * g + b


# -----------------------------------------------------------------------------
# The single fused kernel
# -----------------------------------------------------------------------------
def _acmodel_kernel(p1_ref, w_ref, out_ref, p_scr, im2_scr, c2_scr, h3_scr):
    # ---- slice the one packed parameter slab (single input DMA) --------------
    w1 = w_ref[R_W1:R_W1 + K1, 0:16]
    w2 = w_ref[R_W2:R_W2 + 64, 0:32]
    w3 = w_ref[R_W3:R_W3 + 128, 0:64]
    w_fc1 = w_ref[R_FC1:R_FC1 + 64, :]
    w_fc2 = w_ref[R_FC2:R_FC2 + 128, 0:8]
    b1 = w_ref[R_VEC:R_VEC + 1, 0:16]
    b2 = w_ref[R_VEC:R_VEC + 1, 32:64]
    b3 = w_ref[R_VEC:R_VEC + 1, 64:128]
    bfc1 = w_ref[R_VEC + 1:R_VEC + 2, :]
    ag1 = w_ref[R_VEC + 2:R_VEC + 3, 0:64]
    cg1 = w_ref[R_VEC + 2:R_VEC + 3, 64:128]
    abt1 = w_ref[R_VEC + 3:R_VEC + 4, 0:64]
    cbt1 = w_ref[R_VEC + 3:R_VEC + 4, 64:128]
    bfc2 = w_ref[R_VEC + 4:R_VEC + 5, 0:8]
    ag2 = w_ref[R_VEC + 5:R_VEC + 6, 0:N_ACTIONS]
    cg2 = w_ref[R_VEC + 5:R_VEC + 6, N_ACTIONS:N_ACTIONS + 1]
    abt2 = w_ref[R_VEC + 6:R_VEC + 7, 0:N_ACTIONS]
    cbt2 = w_ref[R_VEC + 6:R_VEC + 7, N_ACTIONS:N_ACTIONS + 1]

    # ---- conv1 (3->16, 2x2) + ReLU + maxpool(2x2): ONE matmul ----------------
    # p1 rows are (quarter, ph, pw, b) with quarters padded to 24 rows; quarter
    # k = 2*dq+dp holds the conv1 input patch for spatial (2*ph+dp, 2*pw+dq), so
    # the 2x2 max-pool is an elementwise max over four 8-aligned 24-row blocks.
    y1 = jnp.maximum(_dot(p1_ref[...], w1) + b1, 0.0)                  # (96, 16)
    p_scr[...] = jnp.maximum(jnp.maximum(y1[0:QP, :], y1[QP:2 * QP, :]),
                             jnp.maximum(y1[2 * QP:3 * QP, :], y1[3 * QP:4 * QP, :]))
    # p_scr rows (ph, pw, b); only rows [0, 18) are meaningful downstream.

    # ---- conv2 (16->32, 2x2) + ReLU: ONE matmul over in-kernel im2col --------
    # im2 rows = (oh2, ow2, b), cols = (di, dj, cin); each (oh2, di, dj) block is
    # 4 contiguous pooled rows -> 8 small contiguous block copies.
    for oh2 in range(OH2):
        for di in range(2):
            for dj in range(2):
                src = (oh2 + di) * (PW * B) + dj * B
                im2_scr[oh2 * OW2 * B:(oh2 + 1) * OW2 * B,
                        (2 * di + dj) * 16:(2 * di + dj + 1) * 16] = \
                    p_scr[src:src + OW2 * B, :]
    y2 = jnp.maximum(_dot(im2_scr[...], w2) + b2, 0.0)                 # (8, 32)
    c2_scr[...] = y2

    # ---- conv3 (32->64, 2x2) + ReLU: ONE matmul ------------------------------
    # Pack the 4 spatial positions of the conv2 output along lanes -> (B, 128).
    for k in range(4):
        h3_scr[0:B, k * 32:(k + 1) * 32] = c2_scr[k * B:(k + 1) * B, :]
    emb = jnp.maximum(_dot(h3_scr[0:B, :], w3) + b3, 0.0)              # (B, 64)

    # ---- fused actor/critic fc1: ONE (B,64)@(64,128) matmul ------------------
    y1h = _dot(emb, w_fc1) + bfc1                                      # (B, 128)
    h3_scr[0:B, :] = y1h                                               # stage, split at lane 64
    a = h3_scr[0:B, 0:64]
    c = h3_scr[0:B, 64:128]

    a, st_a1 = _mdl(a, B * 64)                  # layer 0: actor_fc1
    a = jnp.tanh(_layernorm(a, ag1, abt1))
    c, st_c1 = _mdl(c, B * 64)                  # layer 2: critic_fc1
    c = jnp.tanh(_layernorm(c, cg1, cbt1))

    # ---- fused actor/critic fc2: ONE (B,128)@(128,8) block-diagonal matmul ---
    h3_scr[0:B, 0:64] = a
    h3_scr[0:B, 64:128] = c
    y2h = _dot(h3_scr[0:B, :], w_fc2) + bfc2                           # (B, 8)
    im2_scr[0:B, 0:8] = y2h                                            # stage, split at lane 7
    a = im2_scr[0:B, 0:N_ACTIONS]
    c = im2_scr[0:B, N_ACTIONS:N_ACTIONS + 1]

    a, st_a2 = _mdl(a, B * N_ACTIONS)           # layer 1: actor_fc2
    a = _layernorm(a, ag2, abt2)
    zmax = jnp.max(a, axis=-1, keepdims=True)
    z = a - zmax
    logp = z - jnp.log(jnp.sum(jnp.exp(z), axis=-1, keepdims=True))    # log_softmax

    c, st_c2 = _mdl(c, B)                       # layer 3: critic_fc2
    value = _layernorm(c, cg2, cbt2)            # LayerNorm(1) -> beta, like reference

    # ---- one lane-dense output slab, few wide stores -------------------------
    out_ref[...] = jnp.zeros((OUT_ROWS, OUT_COLS), jnp.float32)
    out_ref[0:B, 0:N_ACTIONS + 1] = jnp.concatenate([logp, value], axis=1)
    stats = jnp.concatenate(
        [jnp.concatenate(st, axis=1) for st in (st_a1, st_a2, st_c1, st_c2)], axis=0)
    out_ref[B:B + 4, 0:5] = stats   # rows B..B+3: [mean, std, numel, COMP, l_nml]


# -----------------------------------------------------------------------------
# Forward pass wrapper
# -----------------------------------------------------------------------------
def forward(params, image, memory):
    # im2col of the raw observation (host-side glue; under jit this compiles to
    # one small XLA fusion feeding the kernel).  Columns are the 2x2 patch in
    # (kh, kw, cin) order; rows are pre-ordered (quarter=(dq,dp), ph, pw, b) and
    # each quarter is zero-padded to 24 rows so conv1 is a single matmul and the
    # in-kernel max-pool is an aligned elementwise max.
    cols = jnp.concatenate(
        [image[:, kh:kh + OH1, kw:kw + OW1, :] for kh in range(2) for kw in range(2)],
        axis=-1)                                          # (B, 6, 6, 12)
    cols = cols.reshape(B, PH, 2, PW, 2, K1)              # (b, ph, dp, pw, dq, c)
    p1q = jnp.transpose(cols, (4, 2, 1, 3, 0, 5)).reshape(4, Q_ROWS, K1)
    p1 = jnp.pad(p1q, ((0, 0), (0, QP - Q_ROWS), (0, 0))).reshape(P1_ROWS, K1)

    vmem = pl.BlockSpec(memory_space=pltpu.MemorySpace.VMEM)
    out = pl.pallas_call(
        _acmodel_kernel,
        out_shape=jax.ShapeDtypeStruct((OUT_ROWS, OUT_COLS), jnp.float32),
        in_specs=[vmem, vmem],
        out_specs=vmem,
        scratch_shapes=[
            pltpu.VMEM((QP, 16), jnp.float32),             # pooled conv1 output
            pltpu.VMEM((OH2 * OW2 * B, 64), jnp.float32),  # conv2 im2col / fc2 staging
            pltpu.VMEM((OH2 * OW2 * B, 32), jnp.float32),  # conv2 output
            pltpu.VMEM((8, 128), jnp.float32),             # conv3 input / fc staging
        ],
    )(p1, params["slab"])

    logp = out[0:B, 0:N_ACTIONS]                 # Categorical logits (log-probs)
    value = out[0:B, VAL_COL]                    # value = x.squeeze(1)
    stats = out[B:B + 4, :]
    x_history_new = [stats[i, 0:3] for i in range(4)]   # [mean, std, numel]
    comp_new = [stats[i, 3] for i in range(4)]
    l_new = [stats[i, 4] for i in range(4)]
    return logp, value, memory, x_history_new, comp_new, l_new


# -----------------------------------------------------------------------------
# Deterministic parameter construction (mirrors __init__ + init_params) packed
# into a single lane-dense (408, 128) f32 slab -> one weight DMA per call.
# -----------------------------------------------------------------------------
def make_params(key):
    ks = jax.random.split(key, 8)

    def conv_w(k, cin, cout):
        # deterministic stand-in for PyTorch's default conv init; rows ordered
        # (kh, kw, cin): w[(kh*2+kw)*cin + ci, co].  Conv biases left at 0.
        return jax.random.normal(k, (4 * cin, cout), jnp.float32) / math.sqrt(4 * cin)

    def linear(k, din, dout):
        # init_params: normal(0,1), row-normalized over the input dim, bias = 0
        w = jax.random.normal(k, (dout, din), jnp.float32)
        w = w / jnp.sqrt(jnp.sum(w ** 2, axis=1, keepdims=True))
        return w.T.astype(jnp.float32), jnp.zeros((dout,), jnp.float32)

    w1 = conv_w(ks[0], CIN, 16)            # (12, 16)
    w2 = conv_w(ks[1], 16, 32)             # (64, 32)
    w3 = conv_w(ks[2], 32, 64)             # (128, 64)
    aw1, ab1 = linear(ks[3], EMBED, 64)    # (64, 64)
    aw2, ab2 = linear(ks[4], 64, N_ACTIONS)
    cw1, cb1 = linear(ks[5], EMBED, 64)
    cw2, cb2 = linear(ks[6], 64, 1)

    # fused head weights
    w_fc1 = jnp.concatenate([aw1, cw1], axis=1)                  # (64, 128)
    w_fc2 = jnp.zeros((128, 8), jnp.float32)                     # block-diagonal
    w_fc2 = w_fc2.at[0:64, 0:N_ACTIONS].set(aw2)
    w_fc2 = w_fc2.at[64:128, N_ACTIONS:N_ACTIONS + 1].set(cw2)

    # biases + LayerNorm params packed into an (8,128) block:
    #   row 0: conv1 b [0:16] | conv2 b [32:64] | conv3 b [64:128]   (all zero)
    #   row 1: [actor_fc1 b | critic_fc1 b]
    #   row 2: [actor_fc1_ln g | critic_fc1_ln g]  (ones)
    #   row 3: [actor_fc1_ln b | critic_fc1_ln b]  (zeros)
    #   row 4: [actor_fc2 b (7) | critic_fc2 b (1)]
    #   row 5: [actor_fc2_ln g (7) | critic_fc2_ln g (1)]  (ones)
    #   row 6: [actor_fc2_ln b (7) | critic_fc2_ln b (1)]  (zeros)
    vec = jnp.zeros((8, 128), jnp.float32)
    vec = vec.at[1, 0:64].set(ab1)
    vec = vec.at[1, 64:128].set(cb1)
    vec = vec.at[2, :].set(jnp.ones((128,), jnp.float32))
    vec = vec.at[4, 0:N_ACTIONS].set(ab2)
    vec = vec.at[4, N_ACTIONS].set(cb2[0])
    vec = vec.at[5, 0:N_ACTIONS + 1].set(jnp.ones((N_ACTIONS + 1,), jnp.float32))

    slab = jnp.zeros((W_ROWS, 128), jnp.float32)
    slab = slab.at[R_FC1:R_FC1 + 64, :].set(w_fc1)
    slab = slab.at[R_W3:R_W3 + 128, 0:64].set(w3)
    slab = slab.at[R_FC2:R_FC2 + 128, 0:8].set(w_fc2)
    slab = slab.at[R_W2:R_W2 + 64, 0:32].set(w2)
    slab = slab.at[R_W1:R_W1 + K1, 0:16].set(w1)
    slab = slab.at[R_VEC:R_VEC + 8, :].set(vec)
    return dict(slab=slab)


if __name__ == "__main__":
    key = jax.random.PRNGKey(0)
    kp, kimg = jax.random.split(key)
    params = make_params(kp)

    image = jax.random.uniform(kimg, (B, IMG_H, IMG_W, CIN), jnp.float32, 0.0, 10.0)
    memory = jnp.zeros((B, 2 * EMBED), jnp.float32)   # unused (use_memory=False)

    outs = jax.jit(forward)(params, image, memory)
    jax.block_until_ready(outs)
    print("KERNEL_OK")
</pallas_src>

<mosaic_0001>
module attributes {stable_mosaic.version = 11 : i64} {
  func.func @_acmodel_kernel(%arg0: memref<96x12xf32, #tpu.memory_space<vmem>>, %arg1: memref<408x128xf32, #tpu.memory_space<vmem>>, %arg2: memref<8x128xf32, #tpu.memory_space<vmem>>, %arg3: memref<24x16xf32, #tpu.memory_space<vmem>>, %arg4: memref<8x64xf32, #tpu.memory_space<vmem>>, %arg5: memref<8x32xf32, #tpu.memory_space<vmem>>, %arg6: memref<8x128xf32, #tpu.memory_space<vmem>>) attributes {dimension_semantics = [], scalar_prefetch = 0 : i64, scratch_operands = 4 : i64, tpu.core_type = #tpu.core_type<tc>} {
    %c384 = arith.constant 384 : index
    %c0 = arith.constant 0 : index
    %0 = vector.load %arg1[%c384, %c0] : memref<408x128xf32, #tpu.memory_space<vmem>>, vector<12x16xf32>
    %c320 = arith.constant 320 : index
    %c0_0 = arith.constant 0 : index
    %1 = vector.load %arg1[%c320, %c0_0] : memref<408x128xf32, #tpu.memory_space<vmem>>, vector<64x32xf32>
    %c64 = arith.constant 64 : index
    %c0_1 = arith.constant 0 : index
    %2 = vector.load %arg1[%c64, %c0_1] : memref<408x128xf32, #tpu.memory_space<vmem>>, vector<128x64xf32>
    %c0_2 = arith.constant 0 : index
    %c0_3 = arith.constant 0 : index
    %3 = vector.load %arg1[%c0_2, %c0_3] : memref<408x128xf32, #tpu.memory_space<vmem>>, vector<64x128xf32>
    %c192 = arith.constant 192 : index
    %c0_4 = arith.constant 0 : index
    %4 = vector.load %arg1[%c192, %c0_4] : memref<408x128xf32, #tpu.memory_space<vmem>>, vector<128x8xf32>
    %c400 = arith.constant 400 : index
    %c0_5 = arith.constant 0 : index
    %5 = vector.load %arg1[%c400, %c0_5] : memref<408x128xf32, #tpu.memory_space<vmem>>, vector<1x16xf32>
    %c400_6 = arith.constant 400 : index
    %c32 = arith.constant 32 : index
    %6 = vector.load %arg1[%c400_6, %c32] : memref<408x128xf32, #tpu.memory_space<vmem>>, vector<1x32xf32>
    %c400_7 = arith.constant 400 : index
    %c64_8 = arith.constant 64 : index
    %7 = vector.load %arg1[%c400_7, %c64_8] : memref<408x128xf32, #tpu.memory_space<vmem>>, vector<1x64xf32>
    %c401 = arith.constant 401 : index
    %c0_9 = arith.constant 0 : index
    %8 = vector.load %arg1[%c401, %c0_9] : memref<408x128xf32, #tpu.memory_space<vmem>>, vector<1x128xf32>
    %c402 = arith.constant 402 : index
    %c0_10 = arith.constant 0 : index
    %9 = vector.load %arg1[%c402, %c0_10] : memref<408x128xf32, #tpu.memory_space<vmem>>, vector<1x64xf32>
    %c402_11 = arith.constant 402 : index
    %c64_12 = arith.constant 64 : index
    %10 = vector.load %arg1[%c402_11, %c64_12] : memref<408x128xf32, #tpu.memory_space<vmem>>, vector<1x64xf32>
    %c403 = arith.constant 403 : index
    %c0_13 = arith.constant 0 : index
    %11 = vector.load %arg1[%c403, %c0_13] : memref<408x128xf32, #tpu.memory_space<vmem>>, vector<1x64xf32>
    %c403_14 = arith.constant 403 : index
    %c64_15 = arith.constant 64 : index
    %12 = vector.load %arg1[%c403_14, %c64_15] : memref<408x128xf32, #tpu.memory_space<vmem>>, vector<1x64xf32>
    %c404 = arith.constant 404 : index
    %c0_16 = arith.constant 0 : index
    %13 = vector.load %arg1[%c404, %c0_16] : memref<408x128xf32, #tpu.memory_space<vmem>>, vector<1x8xf32>
    %c405 = arith.constant 405 : index
    %c0_17 = arith.constant 0 : index
    %14 = vector.load %arg1[%c405, %c0_17] : memref<408x128xf32, #tpu.memory_space<vmem>>, vector<1x7xf32>
    %c405_18 = arith.constant 405 : index
    %c7 = arith.constant 7 : index
    %15 = vector.load %arg1[%c405_18, %c7] : memref<408x128xf32, #tpu.memory_space<vmem>>, vector<1x1xf32>
    %c406 = arith.constant 406 : index
    %c0_19 = arith.constant 0 : index
    %16 = vector.load %arg1[%c406, %c0_19] : memref<408x128xf32, #tpu.memory_space<vmem>>, vector<1x7xf32>
    %c406_20 = arith.constant 406 : index
    %c7_21 = arith.constant 7 : index
    %17 = vector.load %arg1[%c406_20, %c7_21] : memref<408x128xf32, #tpu.memory_space<vmem>>, vector<1x1xf32>
    %c0_22 = arith.constant 0 : index
    %c0_23 = arith.constant 0 : index
    %18 = vector.load %arg0[%c0_22, %c0_23] : memref<96x12xf32, #tpu.memory_space<vmem>>, vector<96x12xf32>
    %cst = arith.constant dense<0.000000e+00> : vector<96x16xf32>
    %19 = tpu.matmul %18, %0, %cst {dimension_numbers = #tpu.dot_dimension_numbers<[1], [0], [0], [1], [0, 0, 1, 1], [], []>} : vector<96x12xf32>, vector<12x16xf32>, vector<96x16xf32> -> vector<96x16xf32>
    %20 = vector.broadcast %5 : vector<1x16xf32> to vector<96x16xf32>
    %21 = arith.addf %19, %20 : vector<96x16xf32>
    %cst_24 = arith.constant 0.000000e+00 : f32
    %22 = vector.broadcast %cst_24 : f32 to vector<96x16xf32>
    %23 = arith.maximumf %21, %22 : vector<96x16xf32>
    %24 = vector.extract_strided_slice %23 {offsets = [0, 0], sizes = [24, 16], strides = [1, 1]} : vector<96x16xf32> to vector<24x16xf32>
    %25 = vector.extract_strided_slice %23 {offsets = [24, 0], sizes = [24, 16], strides = [1, 1]} : vector<96x16xf32> to vector<24x16xf32>
    %26 = arith.maximumf %24, %25 : vector<24x16xf32>
    %27 = vector.extract_strided_slice %23 {offsets = [48, 0], sizes = [24, 16], strides = [1, 1]} : vector<96x16xf32> to vector<24x16xf32>
    %28 = vector.extract_strided_slice %23 {offsets = [72, 0], sizes = [24, 16], strides = [1, 1]} : vector<96x16xf32> to vector<24x16xf32>
    %29 = arith.maximumf %27, %28 : vector<24x16xf32>
    %30 = arith.maximumf %26, %29 : vector<24x16xf32>
    %c0_25 = arith.constant 0 : index
    %c0_26 = arith.constant 0 : index
    %31 = vector.load %arg3[%c0_25, %c0_26] : memref<24x16xf32, #tpu.memory_space<vmem>>, vector<24x16xf32>
    tpu.vector_store %arg3[%c0_25, %c0_26], %30 {strides = array<i32>} : memref<24x16xf32, #tpu.memory_space<vmem>>, vector<24x16xf32>,
    %c0_27 = arith.constant 0 : index
    %c0_28 = arith.constant 0 : index
    %32 = vector.load %arg3[%c0_27, %c0_28] : memref<24x16xf32, #tpu.memory_space<vmem>>, vector<4x16xf32>
    %c0_29 = arith.constant 0 : index
    %c0_30 = arith.constant 0 : index
    %33 = vector.load %arg4[%c0_29, %c0_30] : memref<8x64xf32, #tpu.memory_space<vmem>>, vector<4x16xf32>
    tpu.vector_store %arg4[%c0_29, %c0_30], %32 {strides = array<i32>} : memref<8x64xf32, #tpu.memory_space<vmem>>, vector<4x16xf32>,
    %c2 = arith.constant 2 : index
    %c0_31 = arith.constant 0 : index
    %34 = vector.load %arg3[%c2, %c0_31] : memref<24x16xf32, #tpu.memory_space<vmem>>, vector<4x16xf32>
    %c0_32 = arith.constant 0 : index
    %c16 = arith.constant 16 : index
    %35 = vector.load %arg4[%c0_32, %c16] : memref<8x64xf32, #tpu.memory_space<vmem>>, vector<4x16xf32>
    tpu.vector_store %arg4[%c0_32, %c16], %34 {strides = array<i32>} : memref<8x64xf32, #tpu.memory_space<vmem>>, vector<4x16xf32>,
    %c6 = arith.constant 6 : index
    %c0_33 = arith.constant 0 : index
    %36 = vector.load %arg3[%c6, %c0_33] : memref<24x16xf32, #tpu.memory_space<vmem>>, vector<4x16xf32>
    %c0_34 = arith.constant 0 : index
    %c32_35 = arith.constant 32 : index
    %37 = vector.load %arg4[%c0_34, %c32_35] : memref<8x64xf32, #tpu.memory_space<vmem>>, vector<4x16xf32>
    tpu.vector_store %arg4[%c0_34, %c32_35], %36 {strides = array<i32>} : memref<8x64xf32, #tpu.memory_space<vmem>>, vector<4x16xf32>,
    %c8 = arith.constant 8 : index
    %c0_36 = arith.constant 0 : index
    %38 = vector.load %arg3[%c8, %c0_36] : memref<24x16xf32, #tpu.memory_space<vmem>>, vector<4x16xf32>
    %c0_37 = arith.constant 0 : index
    %c48 = arith.constant 48 : index
    %39 = vector.load %arg4[%c0_37, %c48] : memref<8x64xf32, #tpu.memory_space<vmem>>, vector<4x16xf32>
    tpu.vector_store %arg4[%c0_37, %c48], %38 {strides = array<i32>} : memref<8x64xf32, #tpu.memory_space<vmem>>, vector<4x16xf32>,
    %c6_38 = arith.constant 6 : index
    %c0_39 = arith.constant 0 : index
    %40 = vector.load %arg3[%c6_38, %c0_39] : memref<24x16xf32, #tpu.memory_space<vmem>>, vector<4x16xf32>
    %c4 = arith.constant 4 : index
    %c0_40 = arith.constant 0 : index
    %41 = vector.load %arg4[%c4, %c0_40] : memref<8x64xf32, #tpu.memory_space<vmem>>, vector<4x16xf32>
    tpu.vector_store %arg4[%c4, %c0_40], %40 {strides = array<i32>} : memref<8x64xf32, #tpu.memory_space<vmem>>, vector<4x16xf32>,
    %c8_41 = arith.constant 8 : index
    %c0_42 = arith.constant 0 : index
    %42 = vector.load %arg3[%c8_41, %c0_42] : memref<24x16xf32, #tpu.memory_space<vmem>>, vector<4x16xf32>
    %c4_43 = arith.constant 4 : index
    %c16_44 = arith.constant 16 : index
    %43 = vector.load %arg4[%c4_43, %c16_44] : memref<8x64xf32, #tpu.memory_space<vmem>>, vector<4x16xf32>
    tpu.vector_store %arg4[%c4_43, %c16_44], %42 {strides = array<i32>} : memref<8x64xf32, #tpu.memory_space<vmem>>, vector<4x16xf32>,
    %c12 = arith.constant 12 : index
    %c0_45 = arith.constant 0 : index
    %44 = vector.load %arg3[%c12, %c0_45] : memref<24x16xf32, #tpu.memory_space<vmem>>, vector<4x16xf32>
    %c4_46 = arith.constant 4 : index
    %c32_47 = arith.constant 32 : index
    %45 = vector.load %arg4[%c4_46, %c32_47] : memref<8x64xf32, #tpu.memory_space<vmem>>, vector<4x16xf32>
    tpu.vector_store %arg4[%c4_46, %c32_47], %44 {strides = array<i32>} : memref<8x64xf32, #tpu.memory_space<vmem>>, vector<4x16xf32>,
    %c14 = arith.constant 14 : index
    %c0_48 = arith.constant 0 : index
    %46 = vector.load %arg3[%c14, %c0_48] : memref<24x16xf32, #tpu.memory_space<vmem>>, vector<4x16xf32>
    %c4_49 = arith.constant 4 : index
    %c48_50 = arith.constant 48 : index
    %47 = vector.load %arg4[%c4_49, %c48_50] : memref<8x64xf32, #tpu.memory_space<vmem>>, vector<4x16xf32>
    tpu.vector_store %arg4[%c4_49, %c48_50], %46 {strides = array<i32>} : memref<8x64xf32, #tpu.memory_space<vmem>>, vector<4x16xf32>,
    %c0_51 = arith.constant 0 : index
    %c0_52 = arith.constant 0 : index
    %48 = vector.load %arg4[%c0_51, %c0_52] : memref<8x64xf32, #tpu.memory_space<vmem>>, vector<8x64xf32>
    %cst_53 = arith.constant dense<0.000000e+00> : vector<8x32xf32>
    %49 = tpu.matmul %48, %1, %cst_53 {dimension_numbers = #tpu.dot_dimension_numbers<[1], [0], [0], [1], [0, 0, 1, 1], [], []>} : vector<8x64xf32>, vector<64x32xf32>, vector<8x32xf32> -> vector<8x32xf32>
    %50 = vector.broadcast %6 : vector<1x32xf32> to vector<8x32xf32>
    %51 = arith.addf %49, %50 : vector<8x32xf32>
    %cst_54 = arith.constant 0.000000e+00 : f32
    %52 = vector.broadcast %cst_54 : f32 to vector<8x32xf32>
    %53 = arith.maximumf %51, %52 : vector<8x32xf32>
    %c0_55 = arith.constant 0 : index
    %c0_56 = arith.constant 0 : index
    %54 = vector.load %arg5[%c0_55, %c0_56] : memref<8x32xf32, #tpu.memory_space<vmem>>, vector<8x32xf32>
    tpu.vector_store %arg5[%c0_55, %c0_56], %53 {strides = array<i32>} : memref<8x32xf32, #tpu.memory_space<vmem>>, vector<8x32xf32>,
    %c0_57 = arith.constant 0 : index
    %c0_58 = arith.constant 0 : index
    %55 = vector.load %arg5[%c0_57, %c0_58] : memref<8x32xf32, #tpu.memory_space<vmem>>, vector<2x32xf32>
    %c0_59 = arith.constant 0 : index
    %c0_60 = arith.constant 0 : index
    %56 = vector.load %arg6[%c0_59, %c0_60] : memref<8x128xf32, #tpu.memory_space<vmem>>, vector<2x32xf32>
    tpu.vector_store %arg6[%c0_59, %c0_60], %55 {strides = array<i32>} : memref<8x128xf32, #tpu.memory_space<vmem>>, vector<2x32xf32>,
    %c2_61 = arith.constant 2 : index
    %c0_62 = arith.constant 0 : index
    %57 = vector.load %arg5[%c2_61, %c0_62] : memref<8x32xf32, #tpu.memory_space<vmem>>, vector<2x32xf32>
    %c0_63 = arith.constant 0 : index
    %c32_64 = arith.constant 32 : index
    %58 = vector.load %arg6[%c0_63, %c32_64] : memref<8x128xf32, #tpu.memory_space<vmem>>, vector<2x32xf32>
    tpu.vector_store %arg6[%c0_63, %c32_64], %57 {strides = array<i32>} : memref<8x128xf32, #tpu.memory_space<vmem>>, vector<2x32xf32>,
    %c4_65 = arith.constant 4 : index
    %c0_66 = arith.constant 0 : index
    %59 = vector.load %arg5[%c4_65, %c0_66] : memref<8x32xf32, #tpu.memory_space<vmem>>, vector<2x32xf32>
    %c0_67 = arith.constant 0 : index
    %c64_68 = arith.constant 64 : index
    %60 = vector.load %arg6[%c0_67, %c64_68] : memref<8x128xf32, #tpu.memory_space<vmem>>, vector<2x32xf32>
    tpu.vector_store %arg6[%c0_67, %c64_68], %59 {strides = array<i32>} : memref<8x128xf32, #tpu.memory_space<vmem>>, vector<2x32xf32>,
    %c6_69 = arith.constant 6 : index
    %c0_70 = arith.constant 0 : index
    %61 = vector.load %arg5[%c6_69, %c0_70] : memref<8x32xf32, #tpu.memory_space<vmem>>, vector<2x32xf32>
    %c0_71 = arith.constant 0 : index
    %c96 = arith.constant 96 : index
    %62 = vector.load %arg6[%c0_71, %c96] : memref<8x128xf32, #tpu.memory_space<vmem>>, vector<2x32xf32>
    tpu.vector_store %arg6[%c0_71, %c96], %61 {strides = array<i32>} : memref<8x128xf32, #tpu.memory_space<vmem>>, vector<2x32xf32>,
    %c0_72 = arith.constant 0 : index
    %c0_73 = arith.constant 0 : index
    %63 = vector.load %arg6[%c0_72, %c0_73] : memref<8x128xf32, #tpu.memory_space<vmem>>, vector<2x128xf32>
    %cst_74 = arith.constant dense<0.000000e+00> : vector<2x64xf32>
    %64 = tpu.matmul %63, %2, %cst_74 {dimension_numbers = #tpu.dot_dimension_numbers<[1], [0], [0], [1], [0, 0, 1, 1], [], []>} : vector<2x128xf32>, vector<128x64xf32>, vector<2x64xf32> -> vector<2x64xf32>
    %65 = vector.broadcast %7 : vector<1x64xf32> to vector<2x64xf32>
    %66 = arith.addf %64, %65 : vector<2x64xf32>
    %cst_75 = arith.constant 0.000000e+00 : f32
    %67 = vector.broadcast %cst_75 : f32 to vector<2x64xf32>
    %68 = arith.maximumf %66, %67 : vector<2x64xf32>
    %cst_76 = arith.constant dense<0.000000e+00> : vector<2x128xf32>
    %69 = tpu.matmul %68, %3, %cst_76 {dimension_numbers = #tpu.dot_dimension_numbers<[1], [0], [0], [1], [0, 0, 1, 1], [], []>} : vector<2x64xf32>, vector<64x128xf32>, vector<2x128xf32> -> vector<2x128xf32>
    %70 = vector.broadcast %8 : vector<1x128xf32> to vector<2x128xf32>
    %71 = arith.addf %69, %70 : vector<2x128xf32>
    %c0_77 = arith.constant 0 : index
    %c0_78 = arith.constant 0 : index
    %72 = vector.load %arg6[%c0_77, %c0_78] : memref<8x128xf32, #tpu.memory_space<vmem>>, vector<2x128xf32>
    tpu.vector_store %arg6[%c0_77, %c0_78], %71 {strides = array<i32>} : memref<8x128xf32, #tpu.memory_space<vmem>>, vector<2x128xf32>,
    %c0_79 = arith.constant 0 : index
    %c0_80 = arith.constant 0 : index
    %73 = vector.load %arg6[%c0_79, %c0_80] : memref<8x128xf32, #tpu.memory_space<vmem>>, vector<2x64xf32>
    %c0_81 = arith.constant 0 : index
    %c64_82 = arith.constant 64 : index
    %74 = vector.load %arg6[%c0_81, %c64_82] : memref<8x128xf32, #tpu.memory_space<vmem>>, vector<2x64xf32>
    %cst_83 = arith.constant dense<0.000000e+00> : vector<2xf32>
    %75 = vector.multi_reduction <add>, %73, %cst_83 [1] : vector<2x64xf32> to vector<2xf32>
    %76 = vector.shape_cast %75 : vector<2xf32> to vector<2x1xf32>
    %cst_84 = arith.constant dense<0.000000e+00> : vector<1xf32>
    %77 = vector.multi_reduction <add>, %76, %cst_84 [0] : vector<2x1xf32> to vector<1xf32>
    %78 = vector.shape_cast %77 : vector<1xf32> to vector<1x1xf32>
    %cst_85 = arith.constant 1.280000e+02 : f32
    %79 = vector.broadcast %cst_85 : f32 to vector<1x1xf32>
    %80 = arith.divf %78, %79 : vector<1x1xf32>
    %81 = vector.broadcast %80 : vector<1x1xf32> to vector<2x64xf32>
    %82 = arith.subf %73, %81 : vector<2x64xf32>
    %83 = arith.mulf %82, %82 : vector<2x64xf32>
    %cst_86 = arith.constant dense<0.000000e+00> : vector<2xf32>
    %84 = vector.multi_reduction <add>, %83, %cst_86 [1] : vector<2x64xf32> to vector<2xf32>
    %85 = vector.shape_cast %84 : vector<2xf32> to vector<2x1xf32>
    %cst_87 = arith.constant dense<0.000000e+00> : vector<1xf32>
    %86 = vector.multi_reduction <add>, %85, %cst_87 [0] : vector<2x1xf32> to vector<1xf32>
    %87 = vector.shape_cast %86 : vector<1xf32> to vector<1x1xf32>
    %cst_88 = arith.constant 1.270000e+02 : f32
    %88 = vector.broadcast %cst_88 : f32 to vector<1x1xf32>
    %89 = arith.divf %87, %88 : vector<1x1xf32>
    %90 = math.sqrt %89 : vector<1x1xf32>
    %91 = arith.mulf %82, %82 : vector<2x64xf32>
    %cst_89 = arith.constant -5.000000e-01 : f32
    %92 = vector.broadcast %cst_89 : f32 to vector<2x64xf32>
    %93 = arith.mulf %92, %91 : vector<2x64xf32>
    %94 = vector.broadcast %89 : vector<1x1xf32> to vector<2x64xf32>
    %95 = arith.divf %93, %94 : vector<2x64xf32>
    %96 = math.log %89 : vector<1x1xf32>
    %cst_90 = arith.constant 5.000000e-01 : f32
    %97 = vector.broadcast %cst_90 : f32 to vector<1x1xf32>
    %98 = arith.mulf %97, %96 : vector<1x1xf32>
    %99 = vector.broadcast %98 : vector<1x1xf32> to vector<2x64xf32>
    %100 = arith.subf %95, %99 : vector<2x64xf32>
    %cst_91 = arith.constant 0.918938517 : f32
    %101 = vector.broadcast %cst_91 : f32 to vector<2x64xf32>
    %102 = arith.subf %100, %101 : vector<2x64xf32>
    %cst_92 = arith.constant dense<0xFF800000> : vector<2xf32>
    %103 = vector.multi_reduction <maximumf>, %102, %cst_92 [1] : vector<2x64xf32> to vector<2xf32>
    %104 = vector.shape_cast %103 : vector<2xf32> to vector<2x1xf32>
    %cst_93 = arith.constant dense<0xFF800000> : vector<1xf32>
    %105 = vector.multi_reduction <maximumf>, %104, %cst_93 [0] : vector<2x1xf32> to vector<1xf32>
    %106 = vector.shape_cast %105 : vector<1xf32> to vector<1x1xf32>
    %107 = vector.broadcast %106 : vector<1x1xf32> to vector<2x64xf32>
    %108 = arith.subf %102, %107 : vector<2x64xf32>
    %109 = math.exp %108 : vector<2x64xf32>
    %cst_94 = arith.constant dense<0.000000e+00> : vector<2xf32>
    %110 = vector.multi_reduction <add>, %109, %cst_94 [1] : vector<2x64xf32> to vector<2xf32>
    %111 = vector.shape_cast %110 : vector<2xf32> to vector<2x1xf32>
    %cst_95 = arith.constant dense<0.000000e+00> : vector<1xf32>
    %112 = vector.multi_reduction <add>, %111, %cst_95 [0] : vector<2x1xf32> to vector<1xf32>
    %113 = vector.shape_cast %112 : vector<1xf32> to vector<1x1xf32>
    %114 = math.log %113 : vector<1x1xf32>
    %115 = arith.addf %106, %114 : vector<1x1xf32>
    %cst_96 = arith.constant 0.000000e+00 : f32
    %116 = vector.broadcast %cst_96 : f32 to vector<1x1xf32>
    %117 = arith.maximumf %115, %116 : vector<1x1xf32>
    %118 = arith.subf %115, %117 : vector<1x1xf32>
    %119 = math.exp %118 : vector<1x1xf32>
    %cst_97 = arith.constant 0.000000e+00 : f32
    %120 = vector.broadcast %cst_97 : f32 to vector<1x1xf32>
    %121 = arith.subf %120, %117 : vector<1x1xf32>
    %122 = math.exp %121 : vector<1x1xf32>
    %123 = arith.addf %119, %122 : vector<1x1xf32>
    %124 = math.log %123 : vector<1x1xf32>
    %125 = arith.addf %117, %124 : vector<1x1xf32>
    %126 = arith.subf %125, %115 : vector<1x1xf32>
    %cst_98 = arith.constant 1.280000e+02 : f32
    %127 = vector.broadcast %cst_98 : f32 to vector<1x1xf32>
    %128 = vector.broadcast %126 : vector<1x1xf32> to vector<2x64xf32>
    %129 = arith.mulf %128, %73 : vector<2x64xf32>
    %cst_99 = arith.constant dense<0.000000e+00> : vector<2xf32>
    %130 = vector.multi_reduction <add>, %129, %cst_99 [1] : vector<2x64xf32> to vector<2xf32>
    %131 = vector.shape_cast %130 : vector<2xf32> to vector<2x1xf32>
    %cst_100 = arith.constant 6.400000e+01 : f32
    %132 = vector.broadcast %cst_100 : f32 to vector<2x1xf32>
    %133 = arith.divf %131, %132 : vector<2x1xf32>
    %134 = vector.broadcast %133 : vector<2x1xf32> to vector<2x64xf32>
    %135 = arith.subf %129, %134 : vector<2x64xf32>
    %136 = arith.mulf %135, %135 : vector<2x64xf32>
    %cst_101 = arith.constant dense<0.000000e+00> : vector<2xf32>
    %137 = vector.multi_reduction <add>, %136, %cst_101 [1] : vector<2x64xf32> to vector<2xf32>
    %138 = vector.shape_cast %137 : vector<2xf32> to vector<2x1xf32>
    %cst_102 = arith.constant 6.400000e+01 : f32
    %139 = vector.broadcast %cst_102 : f32 to vector<2x1xf32>
    %140 = arith.divf %138, %139 : vector<2x1xf32>
    %141 = vector.broadcast %133 : vector<2x1xf32> to vector<2x64xf32>
    %142 = arith.subf %129, %141 : vector<2x64xf32>
    %cst_103 = arith.constant 9.99999974E-6 : f32
    %143 = vector.broadcast %cst_103 : f32 to vector<2x1xf32>
    %144 = arith.addf %140, %143 : vector<2x1xf32>
    %145 = math.rsqrt %144 : vector<2x1xf32>
    %146 = vector.broadcast %145 : vector<2x1xf32> to vector<2x64xf32>
    %147 = arith.mulf %142, %146 : vector<2x64xf32>
    %148 = vector.broadcast %9 : vector<1x64xf32> to vector<2x64xf32>
    %149 = arith.mulf %147, %148 : vector<2x64xf32>
    %150 = vector.broadcast %11 : vector<1x64xf32> to vector<2x64xf32>
    %151 = arith.addf %149, %150 : vector<2x64xf32>
    %152 = math.tanh %151 : vector<2x64xf32>
    %cst_104 = arith.constant dense<0.000000e+00> : vector<2xf32>
    %153 = vector.multi_reduction <add>, %74, %cst_104 [1] : vector<2x64xf32> to vector<2xf32>
    %154 = vector.shape_cast %153 : vector<2xf32> to vector<2x1xf32>
    %cst_105 = arith.constant dense<0.000000e+00> : vector<1xf32>
    %155 = vector.multi_reduction <add>, %154, %cst_105 [0] : vector<2x1xf32> to vector<1xf32>
    %156 = vector.shape_cast %155 : vector<1xf32> to vector<1x1xf32>
    %cst_106 = arith.constant 1.280000e+02 : f32
    %157 = vector.broadcast %cst_106 : f32 to vector<1x1xf32>
    %158 = arith.divf %156, %157 : vector<1x1xf32>
    %159 = vector.broadcast %158 : vector<1x1xf32> to vector<2x64xf32>
    %160 = arith.subf %74, %159 : vector<2x64xf32>
    %161 = arith.mulf %160, %160 : vector<2x64xf32>
    %cst_107 = arith.constant dense<0.000000e+00> : vector<2xf32>
    %162 = vector.multi_reduction <add>, %161, %cst_107 [1] : vector<2x64xf32> to vector<2xf32>
    %163 = vector.shape_cast %162 : vector<2xf32> to vector<2x1xf32>
    %cst_108 = arith.constant dense<0.000000e+00> : vector<1xf32>
    %164 = vector.multi_reduction <add>, %163, %cst_108 [0] : vector<2x1xf32> to vector<1xf32>
    %165 = vector.shape_cast %164 : vector<1xf32> to vector<1x1xf32>
    %cst_109 = arith.constant 1.270000e+02 : f32
    %166 = vector.broadcast %cst_109 : f32 to vector<1x1xf32>
    %167 = arith.divf %165, %166 : vector<1x1xf32>
    %168 = math.sqrt %167 : vector<1x1xf32>
    %169 = arith.mulf %160, %160 : vector<2x64xf32>
    %cst_110 = arith.constant -5.000000e-01 : f32
    %170 = vector.broadcast %cst_110 : f32 to vector<2x64xf32>
    %171 = arith.mulf %170, %169 : vector<2x64xf32>
    %172 = vector.broadcast %167 : vector<1x1xf32> to vector<2x64xf32>
    %173 = arith.divf %171, %172 : vector<2x64xf32>
    %174 = math.log %167 : vector<1x1xf32>
    %cst_111 = arith.constant 5.000000e-01 : f32
    %175 = vector.broadcast %cst_111 : f32 to vector<1x1xf32>
    %176 = arith.mulf %175, %174 : vector<1x1xf32>
    %177 = vector.broadcast %176 : vector<1x1xf32> to vector<2x64xf32>
    %178 = arith.subf %173, %177 : vector<2x64xf32>
    %cst_112 = arith.constant 0.918938517 : f32
    %179 = vector.broadcast %cst_112 : f32 to vector<2x64xf32>
    %180 = arith.subf %178, %179 : vector<2x64xf32>
    %cst_113 = arith.constant dense<0xFF800000> : vector<2xf32>
    %181 = vector.multi_reduction <maximumf>, %180, %cst_113 [1] : vector<2x64xf32> to vector<2xf32>
    %182 = vector.shape_cast %181 : vector<2xf32> to vector<2x1xf32>
    %cst_114 = arith.constant dense<0xFF800000> : vector<1xf32>
    %183 = vector.multi_reduction <maximumf>, %182, %cst_114 [0] : vector<2x1xf32> to vector<1xf32>
    %184 = vector.shape_cast %183 : vector<1xf32> to vector<1x1xf32>
    %185 = vector.broadcast %184 : vector<1x1xf32> to vector<2x64xf32>
    %186 = arith.subf %180, %185 : vector<2x64xf32>
    %187 = math.exp %186 : vector<2x64xf32>
    %cst_115 = arith.constant dense<0.000000e+00> : vector<2xf32>
    %188 = vector.multi_reduction <add>, %187, %cst_115 [1] : vector<2x64xf32> to vector<2xf32>
    %189 = vector.shape_cast %188 : vector<2xf32> to vector<2x1xf32>
    %cst_116 = arith.constant dense<0.000000e+00> : vector<1xf32>
    %190 = vector.multi_reduction <add>, %189, %cst_116 [0] : vector<2x1xf32> to vector<1xf32>
    %191 = vector.shape_cast %190 : vector<1xf32> to vector<1x1xf32>
    %192 = math.log %191 : vector<1x1xf32>
    %193 = arith.addf %184, %192 : vector<1x1xf32>
    %cst_117 = arith.constant 0.000000e+00 : f32
    %194 = vector.broadcast %cst_117 : f32 to vector<1x1xf32>
    %195 = arith.maximumf %193, %194 : vector<1x1xf32>
    %196 = arith.subf %193, %195 : vector<1x1xf32>
    %197 = math.exp %196 : vector<1x1xf32>
    %cst_118 = arith.constant 0.000000e+00 : f32
    %198 = vector.broadcast %cst_118 : f32 to vector<1x1xf32>
    %199 = arith.subf %198, %195 : vector<1x1xf32>
    %200 = math.exp %199 : vector<1x1xf32>
    %201 = arith.addf %197, %200 : vector<1x1xf32>
    %202 = math.log %201 : vector<1x1xf32>
    %203 = arith.addf %195, %202 : vector<1x1xf32>
    %204 = arith.subf %203, %193 : vector<1x1xf32>
    %cst_119 = arith.constant 1.280000e+02 : f32
    %205 = vector.broadcast %cst_119 : f32 to vector<1x1xf32>
    %206 = vector.broadcast %204 : vector<1x1xf32> to vector<2x64xf32>
    %207 = arith.mulf %206, %74 : vector<2x64xf32>
    %cst_120 = arith.constant dense<0.000000e+00> : vector<2xf32>
    %208 = vector.multi_reduction <add>, %207, %cst_120 [1] : vector<2x64xf32> to vector<2xf32>
    %209 = vector.shape_cast %208 : vector<2xf32> to vector<2x1xf32>
    %cst_121 = arith.constant 6.400000e+01 : f32
    %210 = vector.broadcast %cst_121 : f32 to vector<2x1xf32>
    %211 = arith.divf %209, %210 : vector<2x1xf32>
    %212 = vector.broadcast %211 : vector<2x1xf32> to vector<2x64xf32>
    %213 = arith.subf %207, %212 : vector<2x64xf32>
    %214 = arith.mulf %213, %213 : vector<2x64xf32>
    %cst_122 = arith.constant dense<0.000000e+00> : vector<2xf32>
    %215 = vector.multi_reduction <add>, %214, %cst_122 [1] : vector<2x64xf32> to vector<2xf32>
    %216 = vector.shape_cast %215 : vector<2xf32> to vector<2x1xf32>
    %cst_123 = arith.constant 6.400000e+01 : f32
    %217 = vector.broadcast %cst_123 : f32 to vector<2x1xf32>
    %218 = arith.divf %216, %217 : vector<2x1xf32>
    %219 = vector.broadcast %211 : vector<2x1xf32> to vector<2x64xf32>
    %220 = arith.subf %207, %219 : vector<2x64xf32>
    %cst_124 = arith.constant 9.99999974E-6 : f32
    %221 = vector.broadcast %cst_124 : f32 to vector<2x1xf32>
    %222 = arith.addf %218, %221 : vector<2x1xf32>
    %223 = math.rsqrt %222 : vector<2x1xf32>
    %224 = vector.broadcast %223 : vector<2x1xf32> to vector<2x64xf32>
    %225 = arith.mulf %220, %224 : vector<2x64xf32>
    %226 = vector.broadcast %10 : vector<1x64xf32> to vector<2x64xf32>
    %227 = arith.mulf %225, %226 : vector<2x64xf32>
    %228 = vector.broadcast %12 : vector<1x64xf32> to vector<2x64xf32>
    %229 = arith.addf %227, %228 : vector<2x64xf32>
    %230 = math.tanh %229 : vector<2x64xf32>
    %c0_125 = arith.constant 0 : index
    %c0_126 = arith.constant 0 : index
    %231 = vector.load %arg6[%c0_125, %c0_126] : memref<8x128xf32, #tpu.memory_space<vmem>>, vector<2x64xf32>
    tpu.vector_store %arg6[%c0_125, %c0_126], %152 {strides = array<i32>} : memref<8x128xf32, #tpu.memory_space<vmem>>, vector<2x64xf32>,
    %c0_127 = arith.constant 0 : index
    %c64_128 = arith.constant 64 : index
    %232 = vector.load %arg6[%c0_127, %c64_128] : memref<8x128xf32, #tpu.memory_space<vmem>>, vector<2x64xf32>
    tpu.vector_store %arg6[%c0_127, %c64_128], %230 {strides = array<i32>} : memref<8x128xf32, #tpu.memory_space<vmem>>, vector<2x64xf32>,
    %c0_129 = arith.constant 0 : index
    %c0_130 = arith.constant 0 : index
    %233 = vector.load %arg6[%c0_129, %c0_130] : memref<8x128xf32, #tpu.memory_space<vmem>>, vector<2x128xf32>
    %cst_131 = arith.constant dense<0.000000e+00> : vector<2x8xf32>
    %234 = tpu.matmul %233, %4, %cst_131 {dimension_numbers = #tpu.dot_dimension_numbers<[1], [0], [0], [1], [0, 0, 1, 1], [], []>} : vector<2x128xf32>, vector<128x8xf32>, vector<2x8xf32> -> vector<2x8xf32>
    %235 = vector.broadcast %13 : vector<1x8xf32> to vector<2x8xf32>
    %236 = arith.addf %234, %235 : vector<2x8xf32>
    %c0_132 = arith.constant 0 : index
    %c0_133 = arith.constant 0 : index
    %237 = vector.load %arg4[%c0_132, %c0_133] : memref<8x64xf32, #tpu.memory_space<vmem>>, vector<2x8xf32>
    tpu.vector_store %arg4[%c0_132, %c0_133], %236 {strides = array<i32>} : memref<8x64xf32, #tpu.memory_space<vmem>>, vector<2x8xf32>,
    %c0_134 = arith.constant 0 : index
    %c0_135 = arith.constant 0 : index
    %238 = vector.load %arg4[%c0_134, %c0_135] : memref<8x64xf32, #tpu.memory_space<vmem>>, vector<2x7xf32>
    %c0_136 = arith.constant 0 : index
    %c7_137 = arith.constant 7 : index
    %239 = vector.load %arg4[%c0_136, %c7_137] : memref<8x64xf32, #tpu.memory_space<vmem>>, vector<2x1xf32>
    %cst_138 = arith.constant dense<0.000000e+00> : vector<2xf32>
    %240 = vector.multi_reduction <add>, %238, %cst_138 [1] : vector<2x7xf32> to vector<2xf32>
    %241 = vector.shape_cast %240 : vector<2xf32> to vector<2x1xf32>
    %cst_139 = arith.constant dense<0.000000e+00> : vector<1xf32>
    %242 = vector.multi_reduction <add>, %241, %cst_139 [0] : vector<2x1xf32> to vector<1xf32>
    %243 = vector.shape_cast %242 : vector<1xf32> to vector<1x1xf32>
    %cst_140 = arith.constant 1.400000e+01 : f32
    %244 = vector.broadcast %cst_140 : f32 to vector<1x1xf32>
    %245 = arith.divf %243, %244 : vector<1x1xf32>
    %246 = vector.broadcast %245 : vector<1x1xf32> to vector<2x7xf32>
    %247 = arith.subf %238, %246 : vector<2x7xf32>
    %248 = arith.mulf %247, %247 : vector<2x7xf32>
    %cst_141 = arith.constant dense<0.000000e+00> : vector<2xf32>
    %249 = vector.multi_reduction <add>, %248, %cst_141 [1] : vector<2x7xf32> to vector<2xf32>
    %250 = vector.shape_cast %249 : vector<2xf32> to vector<2x1xf32>
    %cst_142 = arith.constant dense<0.000000e+00> : vector<1xf32>
    %251 = vector.multi_reduction <add>, %250, %cst_142 [0] : vector<2x1xf32> to vector<1xf32>
    %252 = vector.shape_cast %251 : vector<1xf32> to vector<1x1xf32>
    %cst_143 = arith.constant 1.300000e+01 : f32
    %253 = vector.broadcast %cst_143 : f32 to vector<1x1xf32>
    %254 = arith.divf %252, %253 : vector<1x1xf32>
    %255 = math.sqrt %254 : vector<1x1xf32>
    %256 = arith.mulf %247, %247 : vector<2x7xf32>
    %cst_144 = arith.constant -5.000000e-01 : f32
    %257 = vector.broadcast %cst_144 : f32 to vector<2x7xf32>
    %258 = arith.mulf %257, %256 : vector<2x7xf32>
    %259 = vector.broadcast %254 : vector<1x1xf32> to vector<2x7xf32>
    %260 = arith.divf %258, %259 : vector<2x7xf32>
    %261 = math.log %254 : vector<1x1xf32>
    %cst_145 = arith.constant 5.000000e-01 : f32
    %262 = vector.broadcast %cst_145 : f32 to vector<1x1xf32>
    %263 = arith.mulf %262, %261 : vector<1x1xf32>
    %264 = vector.broadcast %263 : vector<1x1xf32> to vector<2x7xf32>
    %265 = arith.subf %260, %264 : vector<2x7xf32>
    %cst_146 = arith.constant 0.918938517 : f32
    %266 = vector.broadcast %cst_146 : f32 to vector<2x7xf32>
    %267 = arith.subf %265, %266 : vector<2x7xf32>
    %cst_147 = arith.constant dense<0xFF800000> : vector<2xf32>
    %268 = vector.multi_reduction <maximumf>, %267, %cst_147 [1] : vector<2x7xf32> to vector<2xf32>
    %269 = vector.shape_cast %268 : vector<2xf32> to vector<2x1xf32>
    %cst_148 = arith.constant dense<0xFF800000> : vector<1xf32>
    %270 = vector.multi_reduction <maximumf>, %269, %cst_148 [0] : vector<2x1xf32> to vector<1xf32>
    %271 = vector.shape_cast %270 : vector<1xf32> to vector<1x1xf32>
    %272 = vector.broadcast %271 : vector<1x1xf32> to vector<2x7xf32>
    %273 = arith.subf %267, %272 : vector<2x7xf32>
    %274 = math.exp %273 : vector<2x7xf32>
    %cst_149 = arith.constant dense<0.000000e+00> : vector<2xf32>
    %275 = vector.multi_reduction <add>, %274, %cst_149 [1] : vector<2x7xf32> to vector<2xf32>
    %276 = vector.shape_cast %275 : vector<2xf32> to vector<2x1xf32>
    %cst_150 = arith.constant dense<0.000000e+00> : vector<1xf32>
    %277 = vector.multi_reduction <add>, %276, %cst_150 [0] : vector<2x1xf32> to vector<1xf32>
    %278 = vector.shape_cast %277 : vector<1xf32> to vector<1x1xf32>
    %279 = math.log %278 : vector<1x1xf32>
    %280 = arith.addf %271, %279 : vector<1x1xf32>
    %cst_151 = arith.constant 0.000000e+00 : f32
    %281 = vector.broadcast %cst_151 : f32 to vector<1x1xf32>
    %282 = arith.maximumf %280, %281 : vector<1x1xf32>
    %283 = arith.subf %280, %282 : vector<1x1xf32>
    %284 = math.exp %283 : vector<1x1xf32>
    %cst_152 = arith.constant 0.000000e+00 : f32
    %285 = vector.broadcast %cst_152 : f32 to vector<1x1xf32>
    %286 = arith.subf %285, %282 : vector<1x1xf32>
    %287 = math.exp %286 : vector<1x1xf32>
    %288 = arith.addf %284, %287 : vector<1x1xf32>
    %289 = math.log %288 : vector<1x1xf32>
    %290 = arith.addf %282, %289 : vector<1x1xf32>
    %291 = arith.subf %290, %280 : vector<1x1xf32>
    %cst_153 = arith.constant 1.400000e+01 : f32
    %292 = vector.broadcast %cst_153 : f32 to vector<1x1xf32>
    %293 = vector.broadcast %291 : vector<1x1xf32> to vector<2x7xf32>
    %294 = arith.mulf %293, %238 : vector<2x7xf32>
    %cst_154 = arith.constant dense<0.000000e+00> : vector<2xf32>
    %295 = vector.multi_reduction <add>, %294, %cst_154 [1] : vector<2x7xf32> to vector<2xf32>
    %296 = vector.shape_cast %295 : vector<2xf32> to vector<2x1xf32>
    %cst_155 = arith.constant 7.000000e+00 : f32
    %297 = vector.broadcast %cst_155 : f32 to vector<2x1xf32>
    %298 = arith.divf %296, %297 : vector<2x1xf32>
    %299 = vector.broadcast %298 : vector<2x1xf32> to vector<2x7xf32>
    %300 = arith.subf %294, %299 : vector<2x7xf32>
    %301 = arith.mulf %300, %300 : vector<2x7xf32>
    %cst_156 = arith.constant dense<0.000000e+00> : vector<2xf32>
    %302 = vector.multi_reduction <add>, %301, %cst_156 [1] : vector<2x7xf32> to vector<2xf32>
    %303 = vector.shape_cast %302 : vector<2xf32> to vector<2x1xf32>
    %cst_157 = arith.constant 7.000000e+00 : f32
    %304 = vector.broadcast %cst_157 : f32 to vector<2x1xf32>
    %305 = arith.divf %303, %304 : vector<2x1xf32>
    %306 = vector.broadcast %298 : vector<2x1xf32> to vector<2x7xf32>
    %307 = arith.subf %294, %306 : vector<2x7xf32>
    %cst_158 = arith.constant 9.99999974E-6 : f32
    %308 = vector.broadcast %cst_158 : f32 to vector<2x1xf32>
    %309 = arith.addf %305, %308 : vector<2x1xf32>
    %310 = math.rsqrt %309 : vector<2x1xf32>
    %311 = vector.broadcast %310 : vector<2x1xf32> to vector<2x7xf32>
    %312 = arith.mulf %307, %311 : vector<2x7xf32>
    %313 = vector.broadcast %14 : vector<1x7xf32> to vector<2x7xf32>
    %314 = arith.mulf %312, %313 : vector<2x7xf32>
    %315 = vector.broadcast %16 : vector<1x7xf32> to vector<2x7xf32>
    %316 = arith.addf %314, %315 : vector<2x7xf32>
    %cst_159 = arith.constant dense<0xFF800000> : vector<2xf32>
    %317 = vector.multi_reduction <maximumf>, %316, %cst_159 [1] : vector<2x7xf32> to vector<2xf32>
    %318 = vector.shape_cast %317 : vector<2xf32> to vector<2x1xf32>
    %319 = vector.broadcast %318 : vector<2x1xf32> to vector<2x7xf32>
    %320 = arith.subf %316, %319 : vector<2x7xf32>
    %321 = math.exp %320 : vector<2x7xf32>
    %cst_160 = arith.constant dense<0.000000e+00> : vector<2xf32>
    %322 = vector.multi_reduction <add>, %321, %cst_160 [1] : vector<2x7xf32> to vector<2xf32>
    %323 = vector.shape_cast %322 : vector<2xf32> to vector<2x1xf32>
    %324 = math.log %323 : vector<2x1xf32>
    %325 = vector.broadcast %324 : vector<2x1xf32> to vector<2x7xf32>
    %326 = arith.subf %320, %325 : vector<2x7xf32>
    %cst_161 = arith.constant dense<0.000000e+00> : vector<2xf32>
    %327 = vector.multi_reduction <add>, %239, %cst_161 [1] : vector<2x1xf32> to vector<2xf32>
    %328 = vector.shape_cast %327 : vector<2xf32> to vector<2x1xf32>
    %cst_162 = arith.constant dense<0.000000e+00> : vector<1xf32>
    %329 = vector.multi_reduction <add>, %328, %cst_162 [0] : vector<2x1xf32> to vector<1xf32>
    %330 = vector.shape_cast %329 : vector<1xf32> to vector<1x1xf32>
    %cst_163 = arith.constant 2.000000e+00 : f32
    %331 = vector.broadcast %cst_163 : f32 to vector<1x1xf32>
    %332 = arith.divf %330, %331 : vector<1x1xf32>
    %333 = vector.broadcast %332 : vector<1x1xf32> to vector<2x1xf32>
    %334 = arith.subf %239, %333 : vector<2x1xf32>
    %335 = arith.mulf %334, %334 : vector<2x1xf32>
    %cst_164 = arith.constant dense<0.000000e+00> : vector<2xf32>
    %336 = vector.multi_reduction <add>, %335, %cst_164 [1] : vector<2x1xf32> to vector<2xf32>
    %337 = vector.shape_cast %336 : vector<2xf32> to vector<2x1xf32>
    %cst_165 = arith.constant dense<0.000000e+00> : vector<1xf32>
    %338 = vector.multi_reduction <add>, %337, %cst_165 [0] : vector<2x1xf32> to vector<1xf32>
    %339 = vector.shape_cast %338 : vector<1xf32> to vector<1x1xf32>
    %cst_166 = arith.constant 1.000000e+00 : f32
    %340 = vector.broadcast %cst_166 : f32 to vector<1x1xf32>
    %341 = arith.divf %339, %340 : vector<1x1xf32>
    %342 = math.sqrt %341 : vector<1x1xf32>
    %343 = arith.mulf %334, %334 : vector<2x1xf32>
    %cst_167 = arith.constant -5.000000e-01 : f32
    %344 = vector.broadcast %cst_167 : f32 to vector<2x1xf32>
    %345 = arith.mulf %344, %343 : vector<2x1xf32>
    %346 = vector.broadcast %341 : vector<1x1xf32> to vector<2x1xf32>
    %347 = arith.divf %345, %346 : vector<2x1xf32>
    %348 = math.log %341 : vector<1x1xf32>
    %cst_168 = arith.constant 5.000000e-01 : f32
    %349 = vector.broadcast %cst_168 : f32 to vector<1x1xf32>
    %350 = arith.mulf %349, %348 : vector<1x1xf32>
    %351 = vector.broadcast %350 : vector<1x1xf32> to vector<2x1xf32>
    %352 = arith.subf %347, %351 : vector<2x1xf32>
    %cst_169 = arith.constant 0.918938517 : f32
    %353 = vector.broadcast %cst_169 : f32 to vector<2x1xf32>
    %354 = arith.subf %352, %353 : vector<2x1xf32>
    %cst_170 = arith.constant dense<0xFF800000> : vector<2xf32>
    %355 = vector.multi_reduction <maximumf>, %354, %cst_170 [1] : vector<2x1xf32> to vector<2xf32>
    %356 = vector.shape_cast %355 : vector<2xf32> to vector<2x1xf32>
    %cst_171 = arith.constant dense<0xFF800000> : vector<1xf32>
    %357 = vector.multi_reduction <maximumf>, %356, %cst_171 [0] : vector<2x1xf32> to vector<1xf32>
    %358 = vector.shape_cast %357 : vector<1xf32> to vector<1x1xf32>
    %359 = vector.broadcast %358 : vector<1x1xf32> to vector<2x1xf32>
    %360 = arith.subf %354, %359 : vector<2x1xf32>
    %361 = math.exp %360 : vector<2x1xf32>
    %cst_172 = arith.constant dense<0.000000e+00> : vector<2xf32>
    %362 = vector.multi_reduction <add>, %361, %cst_172 [1] : vector<2x1xf32> to vector<2xf32>
    %363 = vector.shape_cast %362 : vector<2xf32> to vector<2x1xf32>
    %cst_173 = arith.constant dense<0.000000e+00> : vector<1xf32>
    %364 = vector.multi_reduction <add>, %363, %cst_173 [0] : vector<2x1xf32> to vector<1xf32>
    %365 = vector.shape_cast %364 : vector<1xf32> to vector<1x1xf32>
    %366 = math.log %365 : vector<1x1xf32>
    %367 = arith.addf %358, %366 : vector<1x1xf32>
    %cst_174 = arith.constant 0.000000e+00 : f32
    %368 = vector.broadcast %cst_174 : f32 to vector<1x1xf32>
    %369 = arith.maximumf %367, %368 : vector<1x1xf32>
    %370 = arith.subf %367, %369 : vector<1x1xf32>
    %371 = math.exp %370 : vector<1x1xf32>
    %cst_175 = arith.constant 0.000000e+00 : f32
    %372 = vector.broadcast %cst_175 : f32 to vector<1x1xf32>
    %373 = arith.subf %372, %369 : vector<1x1xf32>
    %374 = math.exp %373 : vector<1x1xf32>
    %375 = arith.addf %371, %374 : vector<1x1xf32>
    %376 = math.log %375 : vector<1x1xf32>
    %377 = arith.addf %369, %376 : vector<1x1xf32>
    %378 = arith.subf %377, %367 : vector<1x1xf32>
    %cst_176 = arith.constant 2.000000e+00 : f32
    %379 = vector.broadcast %cst_176 : f32 to vector<1x1xf32>
    %380 = vector.broadcast %378 : vector<1x1xf32> to vector<2x1xf32>
    %381 = arith.mulf %380, %239 : vector<2x1xf32>
    %cst_177 = arith.constant dense<0.000000e+00> : vector<2xf32>
    %382 = vector.multi_reduction <add>, %381, %cst_177 [1] : vector<2x1xf32> to vector<2xf32>
    %383 = vector.shape_cast %382 : vector<2xf32> to vector<2x1xf32>
    %cst_178 = arith.constant 1.000000e+00 : f32
    %384 = vector.broadcast %cst_178 : f32 to vector<2x1xf32>
    %385 = arith.divf %383, %384 : vector<2x1xf32>
    %386 = arith.subf %381, %385 : vector<2x1xf32>
    %387 = arith.mulf %386, %386 : vector<2x1xf32>
    %cst_179 = arith.constant dense<0.000000e+00> : vector<2xf32>
    %388 = vector.multi_reduction <add>, %387, %cst_179 [1] : vector<2x1xf32> to vector<2xf32>
    %389 = vector.shape_cast %388 : vector<2xf32> to vector<2x1xf32>
    %cst_180 = arith.constant 1.000000e+00 : f32
    %390 = vector.broadcast %cst_180 : f32 to vector<2x1xf32>
    %391 = arith.divf %389, %390 : vector<2x1xf32>
    %392 = arith.subf %381, %385 : vector<2x1xf32>
    %cst_181 = arith.constant 9.99999974E-6 : f32
    %393 = vector.broadcast %cst_181 : f32 to vector<2x1xf32>
    %394 = arith.addf %391, %393 : vector<2x1xf32>
    %395 = math.rsqrt %394 : vector<2x1xf32>
    %396 = arith.mulf %392, %395 : vector<2x1xf32>
    %397 = vector.broadcast %15 : vector<1x1xf32> to vector<2x1xf32>
    %398 = arith.mulf %396, %397 : vector<2x1xf32>
    %399 = vector.broadcast %17 : vector<1x1xf32> to vector<2x1xf32>
    %400 = arith.addf %398, %399 : vector<2x1xf32>
    %cst_182 = arith.constant 0.000000e+00 : f32
    %401 = vector.broadcast %cst_182 : f32 to vector<8x128xf32>
    %c0_183 = arith.constant 0 : index
    %c0_184 = arith.constant 0 : index
    %402 = vector.load %arg2[%c0_183, %c0_184] : memref<8x128xf32, #tpu.memory_space<vmem>>, vector<8x128xf32>
    tpu.vector_store %arg2[%c0_183, %c0_184], %401 {strides = array<i32>} : memref<8x128xf32, #tpu.memory_space<vmem>>, vector<8x128xf32>,
    %403 = tpu.concatenate %326, %400 in 1 : vector<2x7xf32>, vector<2x1xf32> -> vector<2x8xf32>
    %c0_185 = arith.constant 0 : index
    %c0_186 = arith.constant 0 : index
    %404 = vector.load %arg2[%c0_185, %c0_186] : memref<8x128xf32, #tpu.memory_space<vmem>>, vector<2x8xf32>
    tpu.vector_store %arg2[%c0_185, %c0_186], %403 {strides = array<i32>} : memref<8x128xf32, #tpu.memory_space<vmem>>, vector<2x8xf32>,
    %405 = tpu.concatenate %80, %90, %127, %125, %126 in 1 : vector<1x1xf32>, vector<1x1xf32>, vector<1x1xf32>, vector<1x1xf32>, vector<1x1xf32> -> vector<1x5xf32>
    %406 = tpu.concatenate %245, %255, %292, %290, %291 in 1 : vector<1x1xf32>, vector<1x1xf32>, vector<1x1xf32>, vector<1x1xf32>, vector<1x1xf32> -> vector<1x5xf32>
    %407 = tpu.concatenate %158, %168, %205, %203, %204 in 1 : vector<1x1xf32>, vector<1x1xf32>, vector<1x1xf32>, vector<1x1xf32>, vector<1x1xf32> -> vector<1x5xf32>
    %408 = tpu.concatenate %332, %342, %379, %377, %378 in 1 : vector<1x1xf32>, vector<1x1xf32>, vector<1x1xf32>, vector<1x1xf32>, vector<1x1xf32> -> vector<1x5xf32>
    %409 = tpu.concatenate %405, %406, %407, %408 in 0 : vector<1x5xf32>, vector<1x5xf32>, vector<1x5xf32>, vector<1x5xf32> -> vector<4x5xf32>
    %c2_187 = arith.constant 2 : index
    %c0_188 = arith.constant 0 : index
    %410 = vector.load %arg2[%c2_187, %c0_188] : memref<8x128xf32, #tpu.memory_space<vmem>>, vector<4x5xf32>
    tpu.vector_store %arg2[%c2_187, %c0_188], %409 {strides = array<i32>} : memref<8x128xf32, #tpu.memory_space<vmem>>, vector<4x5xf32>,
    return
  }
}

</mosaic_0001>

<bundles_post_ra>
// kernel: forward.1
= control target key start
LH: loop header
LB: loop body
LE: loop exit
PB: predicated region body
PF: predicated region fallthrough
CT: control target
= control target key end

     0   :  { %vm121_vm0 = vcmask 1043456   ;;  %vm84_vm1 = vcmask 97280   ;;  %vm1530_vm2 = vmmov 1   ;;  %vm271_vm4 = vcmask 130048   ;;  %s1532_s20 = smov 16   ;;  %s1535_s29 = smov 32   ;;  %s1978_s1 = inlined_call_operand.vmem [shape: f32[408,128], index: 1, kind: input, shape index: {}]   ;;  %s1979_s0 = inlined_call_operand.vmem [shape: f32[96,12], index: 0, kind: input, shape index: {}]   ;;  %s1980_s2 = inlined_call_operand.vmem [shape: f32[8,128], index: 2, kind: output, shape index: {}]  }
   0x1   :  { %v11_v0 = vld [vmem:[%s1978_s1 + $0x180] sm:$0xff]  ;;  %v12_v1 = vld [vmem:[%s1978_s1 + $0x188] sm:$0xf]  ;;  %vm1360_vm3 = vmpackc.low %vm121_vm0, %vm1530_vm2  ;;  %v1531_v62 = vmov 0.0|0.0   ;;  %vm276_vm5 = vcmask 125952   ;;  %vm1533_vm6 = vmmov 0  }
   0x2   :  { %v1359_v2 = vpack.c.bf16 %v12_v1, %v11_v0  ;;  %v68_v3 = vld [vmem:[%s1979_s0] sm:$0xff]  ;;  %v69_v4 = vld [vmem:[%s1979_s0 + $0x8] sm:$0xff]  ;;  %v70_v5 = vld [vmem:[%s1979_s0 + $0x10] sm:$0xff]  ;;  %1365 = vmatprep.subr.bf16.mxu1 %v1531_v62  ;;  %s1536_s30 = smov 48   ;;  %s1537_s3 = smov 96   ;;  %vm283_vm7 = vcmask 257152  }
   0x3   :  { %1233 = vmatprep.mubr.msk.f32.mxu0 %vm84_vm1, %v68_v3  ;;  %v71_v6 = vld [vmem:[%s1979_s0 + $0x18] sm:$0xff]  ;;  %v72_v7 = vld [vmem:[%s1979_s0 + $0x20] sm:$0xff]  ;;  %v73_v8 = vld [vmem:[%s1979_s0 + $0x28] sm:$0xff]  ;;  %vm290_vm8 = vcmask 388352   ;;  %vm297_vm9 = vcmask 519552   ;;  %vm324_vm10 = vcmask 523264  }
   0x4   :  { %1361 = vmatprep.subr.msk.bf16.mxu0 %vm1360_vm3, %v1359_v2  ;;  %v74_v9 = vld [vmem:[%s1979_s0 + $0x30] sm:$0xff]  ;;  %v75_v10 = vld [vmem:[%s1979_s0 + $0x38] sm:$0xff]  ;;  %v76_v11 = vld [vmem:[%s1979_s0 + $0x40] sm:$0xff]  ;;  %vm399_vm11 = vcmask 261120   ;;  %vm402_vm12 = vcmask 254976   ;;  %s1538_s9 = smov 64  }
   0x5   :  { %1364 = vmatpush3.bf16.msk.msra.mxu0 %vm1360_vm3, %v1359_v2  ;;  %v77_v12 = vld [vmem:[%s1979_s0 + $0x48] sm:$0xff]  ;;  %v78_v13 = vld [vmem:[%s1979_s0 + $0x50] sm:$0xff]  ;;  %v79_v14 = vld [vmem:[%s1979_s0 + $0x58] sm:$0xff]  ;;  %vm409_vm13 = vcmask 517376   ;;  %vm416_vm14 = vcmask 779776   ;;  %vm423_vm15 = vcmask 1042176  }
   0x6   :  { %v1615_v16 = vld [vmem:[%s1978_s1 + $0x190] ss:$0 sm:$0xff]  ;;  %v13_v57 = vld [vmem:[%s1978_s1 + $0x140] sm:$0xff]  ;;  %v14_v58 = vld [vmem:[%s1978_s1 + $0x148] sm:$0xff]  ;;  %1377 = vmatprep.subr.bf16.mxu0 %v1531_v62  ;;  %vm579_vm0 = vcmask 517120   ;;  %vm733_vm2 = vcmask 1041920  }
   0x7   :  { %v1366_v60 = vpack.c.bf16 %v14_v58, %v13_v57  ;;  %v15_v1 = vld [vmem:[%s1978_s1 + $0x150] sm:$0xff]  ;;  %v16_v2 = vld [vmem:[%s1978_s1 + $0x158] sm:$0xff]  ;;  %s1539_s8 = smov 122   ;;  %s1542_s12 = smov 125  }
   0x8   :  { %1234 = vmatmul.mubr.msk.f32.vlgmr.msra.gmra.mrb[0].mxu0 %vm84_vm1, %v69_v4  ;;  %v1369_v3 = vpack.c.bf16 %v16_v2, %v15_v1  ;;  %v38_v1 = vld [vmem:[%s1978_s1 + $0x8] sm:$0xff] }
   0x9   :  { %1236 = vmatprep.mubr.msk.f32.mxu0 %vm84_vm1, %v70_v5  ;;  %1367 = vmatpush3.bf16.msra.mxu1 %v1366_v60 }
   0xa   :  { %1368 = vmatprep.subr.bf16.mxu1 %v1531_v62 }
   0xc   :  { %1237 = vmatmul.mubr.msk.f32.gmra.mrb[2].mxu0 %vm84_vm1, %v71_v6  ;;  %v17_v6 = vld [vmem:[%s1978_s1 + $0x160] sm:$0xff] }
   0xd   :  { %1239 = vmatprep.mubr.msk.f32.mxu0 %vm84_vm1, %v72_v7  ;;  %1370 = vmatpush3.bf16.msra.mxu1 %v1369_v3  ;;  %v18_v7 = vld [vmem:[%s1978_s1 + $0x168] sm:$0xff]  ;;  %v40_v3 = vld [vmem:[%s1978_s1 + $0x18] sm:$0xff] }
   0xe   :  { %1371 = vmatprep.subr.bf16.mxu1 %v1531_v62 }
  0x10   :  { %1240 = vmatmul.mubr.msk.f32.gmra.mrb[4].mxu0 %vm84_vm1, %v73_v8  ;;  %v19_v8 = vld [vmem:[%s1978_s1 + $0x170] sm:$0xff] }
  0x11   :  { %1242 = vmatprep.mubr.msk.f32.mxu0 %vm84_vm1, %v74_v9  ;;  %v20_v9 = vld [vmem:[%s1978_s1 + $0x178] sm:$0xff] }
  0x14   :  { %1243 = vmatmul.mubr.msk.f32.gmra.mrb[6].mxu0 %vm84_vm1, %v75_v10  ;;  %v1372_v10 = vpack.c.bf16 %v18_v7, %v17_v6  ;;  %v41_v6 = vld [vmem:[%s1978_s1 + $0x20] sm:$0xff]  ;;  %v42_v7 = vld [vmem:[%s1978_s1 + $0x28] sm:$0xff] }
  0x15   :  { %1245 = vmatprep.mubr.msk.f32.mxu0 %vm84_vm1, %v76_v11  ;;  %v1534_v11 = vmov 0.0  }
  0x16   :  { %1267 = vmatprep.mubr.msk.f32.mxu1 %vm1533_vm6, %v1534_v11  ;;  %1077 = vst [vmem:[%s1980_s2] sm:$0xff] %v1534_v11  ;;  %1373 = vmatpush3.bf16.msra.mxu1 %v1372_v10  ;;  %v44_v10 = vld [vmem:[%s1978_s1 + $0x38] sm:$0xff] }
  0x17   :  { %1374 = vmatprep.subr.bf16.mxu1 %v1531_v62 }
  0x18   :  { %1246 = vmatmul.mubr.msk.f32.gmra.mrb[8].mxu0 %vm84_vm1, %v77_v12  ;;  %v1375_v12 = vpack.c.bf16 %v20_v9, %v19_v8  ;;  %v1408_v8 = vpack.c.bf16 %v42_v7, %v41_v6  ;;  %v43_v9 = vld [vmem:[%s1978_s1 + $0x30] sm:$0xff] }
  0x19   :  { %1248 = vmatprep.mubr.msk.f32.mxu0 %vm84_vm1, %v78_v13 }
  0x1a   :  { %1376 = vmatpush3.bf16.msra.mxu1 %v1375_v12 }
  0x1b   :  { %1413 = vmatprep.subr.bf16.mxu1 %v1531_v62 }
  0x1c   :  { %1249 = vmatmul.mubr.msk.f32.gmra.mrb[10].mxu0 %vm84_vm1, %v79_v14  ;;  %vm583_vm1 = vcmask 1041408  }
  0x1d   :  { %1302 = vmatprep.mubr.msk.f32.mxu0 %vm1533_vm6, %v1534_v11 }
  0xdb   :  { %v1235_v15 = vpop.f32.mrb[0].mxu0 }
  0xdc   :  { %v191_v17 = vpop.f32.mrb[1].mxu0  ;;  %v197_v25 = vadd.f32 %v1235_v15, %v1615_v16 }
  0xdd   :  { %v192_v18 = vadd.f32 %v1615_v16, %v191_v17 }
  0xde   :  { %v251_v33 = vmax.f32 %v197_v25, 0.0 }
  0xdf   :  { %v1238_v19 = vpop.f32.mrb[2].mxu0  ;;  %v250_v22 = vmax.f32 %v192_v18, 0.0 }
  0xe0   :  { %v207_v20 = vadd.f32 %v1238_v19, %v1615_v16  ;;  %v201_v21 = vpop.f32.mrb[3].mxu0 }
  0xe1   :  { %v202_v24 = vadd.f32 %v1615_v16, %v201_v21 }
  0xe2   :  { %v253_v23 = vmax.f32 %v207_v20, 0.0 }
  0xe3   :  { %v1241_v26 = vpop.f32.mrb[4].mxu0  ;;  %v252_v31 = vmax.f32 %v202_v24, 0.0 }
  0xe4   :  { %v262_v27 = vmax.f32 %v250_v22, %v253_v23  ;;  %v217_v28 = vadd.f32 %v1241_v26, %v1615_v16  ;;  %v211_v29 = vpop.f32.mrb[5].mxu0 }
  0xe5   :  { %v212_v30 = vadd.f32 %v1615_v16, %v211_v29  ;;  %v23_v29 = vld [vmem:[%s1978_s1 + $0x50] sm:$0xff] }
  0xe6   :  { %v255_v32 = vmax.f32 %v217_v28, 0.0  ;;  %v22_v28 = vld [vmem:[%s1978_s1 + $0x48] sm:$0xff] }
  0xe7   :  { %v254_v34 = vmax.f32 %v212_v30, 0.0  ;;  %v1244_v35 = vpop.f32.mrb[6].mxu0 }
  0xe8   :  { %v264_v36 = vmax.f32 %v252_v31, %v255_v32  ;;  %v221_v37 = vpop.f32.mrb[7].mxu0  ;;  %v227_v46 = vadd.f32 %v1244_v35, %v1615_v16  ;;  %v24_v31 = vld [vmem:[%s1978_s1 + $0x58] sm:$0xff] }
  0xe9   :  { %v263_v38 = vmax.f32 %v251_v33, %v254_v34  ;;  %v222_v39 = vadd.f32 %v1615_v16, %v221_v37  ;;  %v1381_v32 = vpack.c.bf16 %v24_v31, %v23_v29  ;;  %v25_v33 = vld [vmem:[%s1978_s1 + $0x60] sm:$0xff]  ;;  %v26_v34 = vld [vmem:[%s1978_s1 + $0x68] sm:$0xff]  ;;  %v28_v37 = vld [vmem:[%s1978_s1 + $0x78] sm:$0xff] }
  0xea   :  { %v257_v55 = vmax.f32 %v227_v46, 0.0  ;;  %v1384_v35 = vpack.c.bf16 %v26_v34, %v25_v33 }
  0xeb   :  { %v1247_v40 = vpop.f32.mrb[8].mxu0  ;;  %v256_v43 = vmax.f32 %v222_v39, 0.0  ;;  %v29_v39 = vld [vmem:[%s1978_s1 + $0x80] sm:$0xff] }
  0xec   :  { %v237_v41 = vadd.f32 %v1247_v40, %v1615_v16  ;;  %v231_v42 = vpop.f32.mrb[9].mxu0  ;;  %v30_v40 = vld [vmem:[%s1978_s1 + $0x88] sm:$0xff] }
  0xed   :  { %v232_v45 = vadd.f32 %v1615_v16, %v231_v42 }
  0xee   :  { %v259_v44 = vmax.f32 %v237_v41, 0.0  ;;  %v1390_v41 = vpack.c.bf16 %v30_v40, %v29_v39 }
  0xef   :  { %v1250_v47 = vpop.f32.mrb[10].mxu0  ;;  %v258_v53 = vmax.f32 %v232_v45, 0.0 }
  0xf0   :  { %v265_v48 = vmax.f32 %v256_v43, %v259_v44  ;;  %v247_v49 = vadd.f32 %v1250_v47, %v1615_v16  ;;  %v241_v50 = vpop.f32.mrb[11].mxu0  ;;  %v31_v43 = vld [vmem:[%s1978_s1 + $0x90] sm:$0xff]  ;;  %v32_v44 = vld [vmem:[%s1978_s1 + $0x98] sm:$0xff] }
  0xf1   :  { %v242_v51 = vadd.f32 %v1615_v16, %v241_v50  ;;  %v1393_v46 = vpack.c.bf16 %v32_v44, %v31_v43  ;;  %v33_v50 = vld [vmem:[%s1978_s1 + $0xa0] sm:$0xff] }
  0xf2   :  { %v268_v52 = vmax.f32 %v262_v27, %v265_v48  ;;  %v261_v54 = vmax.f32 %v247_v49, 0.0  ;;  %v21_v27 = vld [vmem:[%s1978_s1 + $0x40] sm:$0xff] }
  0xf3   :  { %v260_v56 = vmax.f32 %v242_v51, 0.0  ;;  %v1378_v30 = vpack.c.bf16 %v22_v28, %v21_v27  ;;  %v34_v51 = vld [vmem:[%s1978_s1 + $0xa8] sm:$0xff] }
  0xf4   :  { %272 = vst.msk [vmem:[#allocation2] sm:$0xff] %vm271_vm4, %v268_v52  ;;  %v267_v59 = vmax.f32 %v258_v53, %v261_v54  ;;  %v1396_v52 = vpack.c.bf16 %v34_v51, %v33_v50  ;;  %v35_v53 = vld [vmem:[%s1978_s1 + $0xb0] sm:$0xff]  ;;  %v36_v54 = vld [vmem:[%s1978_s1 + $0xb8] sm:$0xff] }
  0xf5   :  { %v266_v61 = vmax.f32 %v257_v55, %v260_v56  ;;  %1379 = vmatpush3.bf16.msra.mxu0 %v1378_v30  ;;  %v1399_v55 = vpack.c.bf16 %v36_v54, %v35_v53 }
  0xf6   :  { %v270_v63 = vmax.f32 %v264_v36, %v267_v59  ;;  %1380 = vmatprep.subr.bf16.mxu0 %v1531_v62  ;;  %v27_v36 = vld [vmem:[%s1978_s1 + $0x70] sm:$0xff] }
  0xf7   :  { %v269_v0 = vmax.f32 %v263_v38, %v266_v61  ;;  %v1387_v38 = vpack.c.bf16 %v28_v37, %v27_v36 }
  0xf8   :  { %274 = vst.msk [vmem:[#allocation2 + $0x10] sm:$0xff] %vm271_vm4, %v270_v63 }
  0xf9   :  { %273 = vst.msk [vmem:[#allocation2 + $0x8] sm:$0xff] %vm271_vm4, %v269_v0  ;;  %1382 = vmatpush3.bf16.msra.mxu0 %v1381_v32  ;;  %v37_v0 = vld [vmem:[%s1978_s1] sm:$0xff] }
  0xfa   :  { %1383 = vmatprep.subr.bf16.mxu0 %v1531_v62  ;;  %v1402_v2 = vpack.c.bf16 %v38_v1, %v37_v0 }
  0xfb   :  { %v278_v4 = vld [vmem:[#allocation2 + $0x2] sm:$0xf] }
  0xfc   :  { %v275_v5 = vld [vmem:[#allocation2] sm:$0xf]  ;;  %280 = vrot.lane.b32.xlu0 %v278_v4, %s1532_s20 }
  0xfd   :  { %277 = vst.msk [vmem:[#allocation3] sm:$0xf] %vm276_vm5, %v275_v5  ;;  %1385 = vmatpush3.bf16.msra.mxu0 %v1384_v35 }
  0xfe   :  { %1386 = vmatprep.subr.bf16.mxu0 %v1531_v62 }
 0x100   :  { %v285_v13 = vld [vmem:[#allocation2 + $0x6] sm:$0xf]  ;;  %v307_v17 = vld [vmem:[#allocation2 + $0xc] sm:$0xf] }
 0x101   :  { %v301_v14 = vld [vmem:[#allocation2 + $0x8] sm:$0xf]  ;;  %287 = vrot.lane.b32.xlu1 %v285_v13, %s1535_s29  ;;  %v313_v19 = vld [vmem:[#allocation2 + $0xe] sm:$0xf]  ;;  %1388 = vmatpush3.bf16.msra.mxu0 %v1387_v38 }
 0x102   :  { %303 = vrot.lane.b32.xlu0 %v301_v14, %s1532_s20  ;;  %v299_v15 = vld [vmem:[#allocation2 + $0x6] sm:$0xf]  ;;  %1389 = vmatprep.subr.bf16.mxu0 %v1531_v62 }
 0x103   :  { %300 = vst.msk [vmem:[#allocation3 + $0x4] sm:$0xf] %vm276_vm5, %v299_v15  ;;  %v292_v18 = vld [vmem:[#allocation2 + $0x8] sm:$0xf]  ;;  %vm1081_vm5 = vcmask 7168  }
 0x105   :  { %309 = vrot.lane.b32.xlu1 %v307_v17, %s1535_s29  ;;  %1391 = vmatpush3.bf16.msra.mxu0 %v1390_v41 }
 0x106   :  { %294 = vrot.lane.b32.xlu0 %v292_v18, %s1536_s30  ;;  %1392 = vmatprep.subr.bf16.mxu0 %v1531_v62  ;;  %v1152_v18 = vld [vmem:[%s1978_s1 + $0x191] ss:$0 sm:$0xff] }
 0x109   :  { %315 = vrot.lane.b32.xlu1 %v313_v19, %s1536_s30  ;;  %1394 = vmatpush3.bf16.msra.mxu0 %v1393_v46 }
 0x10a   :  { %321 = vrot.lane.b32.xlu0 %v1615_v16, %s1537_s3  ;;  %1395 = vmatprep.subr.bf16.mxu0 %v1531_v62 }
 0x10d   :  { %1397 = vmatpush3.bf16.msra.mxu0 %v1396_v52 }
 0x10e   :  { %1398 = vmatprep.subr.bf16.mxu0 %v1531_v62 }
 0x111   :  { %1400 = vmatpush3.bf16.msra.mxu0 %v1399_v55 }
 0x112   :  { %1401 = vmatprep.subr.bf16.mxu0 %v1531_v62 }
 0x16e   :  { %v281_v20 = vpop.permute.xlu0 %280 }
 0x16f   :  { %284 = vst.msk [vmem:[#allocation3] sm:$0xf] %vm283_vm7, %v281_v20 }
 0x173   :  { %v288_v21 = vpop.permute.xlu1 %287 }
 0x174   :  { %v304_v22 = vpop.permute.xlu0 %303  ;;  %291 = vst.msk [vmem:[#allocation3] sm:$0xf] %vm290_vm8, %v288_v21 }
 0x175   :  { %306 = vst.msk [vmem:[#allocation3 + $0x4] sm:$0xf] %vm283_vm7, %v304_v22  ;;  %vm1085_vm7 = vcmask 23552  }
 0x177   :  { %v310_v23 = vpop.permute.xlu1 %309 }
 0x178   :  { %v295_v24 = vpop.permute.xlu0 %294  ;;  %312 = vst.msk [vmem:[#allocation3 + $0x4] sm:$0xf] %vm290_vm8, %v310_v23  ;;  %vm1087_vm8 = vcmask 31744  }
 0x179   :  { %298 = vst.msk [vmem:[#allocation3] sm:$0xf] %vm297_vm9, %v295_v24 }
 0x17b   :  { %v316_v25 = vpop.permute.xlu1 %315 }
 0x17c   :  { %318 = vst.msk [vmem:[#allocation3 + $0x4] sm:$0xf] %vm297_vm9, %v316_v25  ;;  %v322_v42 = vpop.permute.xlu0 %321 }
 0x183   :  { %v319_v26 = vld [vmem:[#allocation3] sm:$0xff] }
 0x184   :  { %1268 = vmatmul.mubr.msk.f32.vlgmr.msra.gmra.mrb[0].mxu1 %vm324_vm10, %v319_v26 }
 0x185   :  { %1356 = vmatprep.mubr.msk.f32.mxu1 %vm1533_vm6, %v1534_v11 }
 0x257   :  { %v394_v45 = vpop.f32.mrb[0].mxu1 }
 0x258   :  { %v395_v47 = vadd.f32 %v394_v45, %v322_v42  ;;  %v1269_v48 = vpop.f32.mrb[1].mxu1 }
 0x25a   :  { %v398_v49 = vmax.f32 %v395_v47, 0.0 }
 0x25c   :  { %400 = vst.msk [vmem:[#allocation4] sm:$0xff] %vm399_vm11, %v398_v49  ;;  %vm878_vm11 = vcmask 58368  }
 0x263   :  { %v411_v56 = vld [vmem:[#allocation4 + $0x4] sm:$0x3]  ;;  %v404_v57 = vld [vmem:[#allocation4 + $0x2] sm:$0x3]  ;;  %v401_v58 = vld [vmem:[#allocation4] sm:$0x3] }
 0x264   :  { %413 = vrot.lane.b32.xlu0 %v411_v56, %s1538_s9  ;;  %406 = vrot.lane.b32.xlu1 %v404_v57, %s1535_s29  ;;  %403 = vst.msk [vmem:[#allocation5] sm:$0x3] %vm402_vm12, %v401_v58  ;;  %v418_v59 = vld [vmem:[#allocation4 + $0x6] sm:$0x3]  ;;  %vm881_vm12 = vcmask 50176  }
 0x268   :  { %420 = vrot.lane.b32.xlu1 %v418_v59, %s1537_s3  ;;  %426 = vrot.lane.b32.xlu0 %v1615_v16, %s1538_s9  ;;  %v39_v16 = vld [vmem:[%s1978_s1 + $0x10] sm:$0xff]  ;;  %s1541_s3 = smov 121  }
 0x269   :  { %v1405_v5 = vpack.c.bf16 %v40_v3, %v39_v16 }
 0x2d6   :  { %v414_v60 = vpop.permute.xlu0 %413  ;;  %v407_v61 = vpop.permute.xlu1 %406 }
 0x2d7   :  { %410 = vst.msk [vmem:[#allocation5] sm:$0x3] %vm409_vm13, %v407_v61  ;;  %vm999_vm13 = vcmask 58424  }
 0x2d8   :  { %417 = vst.msk [vmem:[#allocation5] sm:$0x3] %vm416_vm14, %v414_v60 }
 0x2da   :  { %v421_v63 = vpop.permute.xlu1 %420  ;;  %v427_v12 = vpop.permute.xlu0 %426 }
 0x2db   :  { %424 = vst.msk [vmem:[#allocation5] sm:$0x3] %vm423_vm15, %v421_v63 }
 0x2e2   :  { %v425_v4 = vld [vmem:[#allocation5] sm:$0x3] }
 0x2e3   :  { %1303 = vmatmul.mubr.f32.vlgmr.msra.gmra.mrb[12].mxu0 %v425_v4 }
 0x2e4   :  { %1403 = vmatpush3.bf16.msra.mxu0 %v1402_v2  ;;  %1321 = vmatprep.mubr.msk.f32.mxu0 %vm1533_vm6, %v1534_v11  ;;  %v1411_v11 = vpack.c.bf16 %v44_v10, %v43_v9  ;;  %vm1083_vm6 = vcmask 15360  }
 0x2e5   :  { %1404 = vmatprep.subr.bf16.mxu0 %v1531_v62 }
 0x2e8   :  { %1406 = vmatpush3.bf16.msra.mxu0 %v1405_v5 }
 0x2e9   :  { %1407 = vmatprep.subr.bf16.mxu0 %v1531_v62 }
 0x2ec   :  { %1409 = vmatpush3.bf16.msra.mxu0 %v1408_v8 }
 0x2ed   :  { %1410 = vmatprep.subr.bf16.mxu0 %v1531_v62 }
 0x2f0   :  { %1412 = vmatpush3.bf16.msra.mxu0 %v1411_v11 }
 0x3b6   :  { %v495_v13 = vpop.f32.mrb[12].mxu0 }
 0x3b7   :  { %v496_v14 = vadd.f32 %v495_v13, %v427_v12  ;;  %v1304_v15 = vpop.f32.mrb[13].mxu0 }
 0x3b9   :  { %v499_v17 = vmax.f32 %v496_v14, 0.0 }
 0x3bb   :  { %1322 = vmatmul.mubr.msk.f32.vlgmr.msra.gmra.mrb[14].mxu0 %vm324_vm10, %v499_v17 }
 0x48e   :  { %v573_v19 = vpop.f32.mrb[14].mxu0 }
 0x48f   :  { %v574_v20 = vadd.f32 %v1152_v18, %v573_v19  ;;  %v1323_v21 = vpop.f32.mrb[15].mxu0 }
 0x491   :  { %577 = vst [vmem:[#allocation5] sm:$0x3] %v574_v20 }
 0x498   :  { %v1773_v22 = vld [vmem:[#allocation5] sm:$0x3] }
 0x499   :  { %687 = vrot.lane.b32.xlu1 %v1773_v22, %s1538_s9  ;;  %v580_v25 = vsel %vm579_vm0, %v1773_v22, 0.0 }
 0x50b   :  { %v688_v23 = vpop.permute.xlu1 %687 }
 0x50c   :  { %v690_v24 = vsel %vm579_vm0, %v688_v23, 0.0 }
 0x50d   :  { %691 = vadd.xlane.f32.xlu0 %v690_v24 }
 0x511   :  { %581 = vadd.xlane.f32.xlu0 %v580_v25 }
 0x59a   :  { %v692_v26 = vpop.xlane.xlu0 %691 }
 0x59b   :  { %v693_v27 = vsel %vm583_vm1, %v692_v26, 0.0 }
 0x59c   :  { %v694_v28 = vrot.slane %v693_v27, 4 }
 0x59e   :  { %v695_v29 = vadd.f32 %v694_v28, %v693_v27  ;;  %v582_v39 = vpop.xlane.xlu0 %581 }
 0x59f   :  { %v584_v41 = vsel %vm583_vm1, %v582_v39, 0.0 }
 0x5a0   :  { %v696_v30 = vrot.slane %v695_v29, 2  ;;  %v585_v44 = vrot.slane %v584_v41, 4 }
 0x5a2   :  { %v697_v31 = vadd.f32 %v696_v30, %v695_v29  ;;  %v586_v47 = vadd.f32 %v585_v44, %v584_v41 }
 0x5a4   :  { %v698_v32 = vrot.slane %v697_v31, 1  ;;  %v587_v50 = vrot.slane %v586_v47, 2 }
 0x5a6   :  { %v699_v33 = vadd.f32 %v698_v32, %v697_v31  ;;  %v588_v53 = vadd.f32 %v587_v50, %v586_v47 }
 0x5a8   :  { %v1781_v34 = vmul.f32 0.0078125, %v699_v33  ;;  %v589_v54 = vrot.slane %v588_v53, 1 }
 0x5aa   :  { %v701_v35 = vsub.f32 %v1773_v22, %v1781_v34  ;;  %v590_v55 = vadd.f32 %v589_v54, %v588_v53 }
 0x5ac   :  { %v702_v36 = vmul.f32 %v701_v35, %v701_v35  ;;  %v1793_v60 = vmul.f32 0.0078125, %v590_v55 }
 0x5ae   :  { %704 = vrot.lane.b32.xlu1 %v702_v36, %s1538_s9  ;;  %v725_v58 = vmul.f32 -0.5, %v702_v36  ;;  %v593_v1 = vsub.f32 %v1773_v22, %v1793_v60 }
 0x5b0   :  { %v594_v3 = vmul.f32 %v593_v1, %v593_v1 }
 0x5b2   :  { %v595_v4 = vsel %vm579_vm0, %v594_v3, 0.0  ;;  %v614_v30 = vmul.f32 -0.5, %v594_v3 }
 0x620   :  { %v705_v37 = vpop.permute.xlu1 %704 }
 0x621   :  { %v707_v38 = vsel %vm579_vm0, %v705_v37, 0.0 }
 0x622   :  { %708 = vadd.xlane.f32.xlu1 %v707_v38 }
 0x6af   :  { %v709_v40 = vpop.xlane.xlu1 %708 }
 0x6b0   :  { %v710_v42 = vsel %vm583_vm1, %v709_v40, 0.0 }
 0x6b1   :  { %v711_v43 = vrot.slane %v710_v42, 4 }
 0x6b3   :  { %v712_v45 = vadd.f32 %v711_v43, %v710_v42 }
 0x6b5   :  { %v713_v46 = vrot.slane %v712_v45, 2 }
 0x6b7   :  { %v714_v48 = vadd.f32 %v713_v46, %v712_v45 }
 0x6b9   :  { %v715_v49 = vrot.slane %v714_v48, 1 }
 0x6bb   :  { %v716_v51 = vadd.f32 %v715_v49, %v714_v48 }
 0x6bd   :  { %v1789_v52 = vmul.f32 0.007874016, %v716_v51 }
 0x6bf   :  { %1450 = vrcp.f32 %v1789_v52  ;;  %vm720_vm3 = vcmp.eq.f32.partialorder %v1789_v52, inf  ;;  %vm722_vm4 = vcmp.eq.f32.partialorder %v1789_v52, 0.0 }
 0x6c0   :  { %1452 = vlog2.f32 %v1789_v52 }
 0x6c9   :  { %v1451_v56 = vpop.eup %1450 }
 0x6ca   :  { %v1453_v57 = vpop.eup %1452  ;;  %v727_v61 = vmul.f32 %v1451_v56, %v725_v58 }
 0x6cb   :  { %v729_v59 = vmul.f32 0.6931472, %v1453_v57 }
 0x6cd   :  { %v730_v63 = vmul.f32 0.5, %v729_v59 }
 0x6cf   :  { %v731_v0 = vsub.f32 %v727_v61, %v730_v63 }
 0x6d1   :  { %v1157_v2 = vadd.f32 -0.9189385, %v731_v0 }
 0x6d3   :  { %v734_v16 = vsel %vm733_vm2, %v1157_v2, -inf }
 0x6d4   :  { %735 = vmax.xlane.f32.xlu0 %v734_v16 }
 0x6d8   :  { %596 = vadd.xlane.f32.xlu0 %v595_v4 }
 0x761   :  { %v736_v5 = vpop.xlane.xlu0 %735 }
 0x762   :  { %v737_v6 = vsel %vm583_vm1, %v736_v5, -inf }
 0x763   :  { %v738_v7 = vrot.slane %v737_v6, 4 }
 0x765   :  { %v739_v8 = vmax.f32 %v737_v6, %v738_v7  ;;  %v597_v17 = vpop.xlane.xlu0 %596 }
 0x766   :  { %v598_v18 = vsel %vm583_vm1, %v597_v17, 0.0 }
 0x767   :  { %v740_v9 = vrot.slane %v739_v8, 2  ;;  %v599_v19 = vrot.slane %v598_v18, 4 }
 0x769   :  { %v741_v10 = vmax.f32 %v739_v8, %v740_v9  ;;  %v600_v20 = vadd.f32 %v599_v19, %v598_v18 }
 0x76b   :  { %v742_v11 = vrot.slane %v741_v10, 1  ;;  %v601_v21 = vrot.slane %v600_v20, 2 }
 0x76d   :  { %v743_v12 = vmax.f32 %v741_v10, %v742_v11  ;;  %v602_v23 = vadd.f32 %v601_v21, %v600_v20  ;;  %v723_v11 = vand.u32 2147483648, %v1789_v52 }
 0x76f   :  { %v744_v13 = vsub.f32 %v1157_v2, %v743_v12  ;;  %v603_v24 = vrot.slane %v602_v23, 1 }
 0x771   :  { %v745_v14 = vmul.f32 1.442695, %v744_v13  ;;  %v604_v25 = vadd.f32 %v603_v24, %v602_v23 }
 0x773   :  { %1454 = vpow2.f32 %v745_v14  ;;  %v1802_v26 = vmul.f32 0.007874016, %v604_v25 }
 0x775   :  { %1456 = vlog2.f32 %v1802_v26  ;;  %vm609_vm9 = vcmp.eq.f32.partialorder %v1802_v26, inf  ;;  %vm611_vm10 = vcmp.eq.f32.partialorder %v1802_v26, 0.0 }
 0x776   :  { %1458 = vrcp.f32 %v1802_v26 }
 0x77d   :  { %v1455_v15 = vpop.eup %1454 }
 0x77e   :  { %748 = vrot.lane.b32.xlu1 %v1455_v15, %s1538_s9 }
 0x77f   :  { %v1457_v27 = vpop.eup %1456 }
 0x780   :  { %v618_v28 = vmul.f32 0.6931472, %v1457_v27  ;;  %v1459_v29 = vpop.eup %1458 }
 0x781   :  { %v616_v32 = vmul.f32 %v1459_v29, %v614_v30 }
 0x782   :  { %v619_v31 = vmul.f32 0.5, %v618_v28 }
 0x784   :  { %v620_v33 = vsub.f32 %v616_v32, %v619_v31 }
 0x786   :  { %v1154_v37 = vadd.f32 -0.9189385, %v620_v33 }
 0x788   :  { %v622_v38 = vsel %vm579_vm0, %v1154_v37, -inf }
 0x7f0   :  { %v749_v35 = vpop.permute.xlu1 %748 }
 0x7f1   :  { %v751_v36 = vsel %vm579_vm0, %v749_v35, 0.0 }
 0x7f2   :  { %752 = vadd.xlane.f32.xlu0 %v751_v36 }
 0x7f6   :  { %623 = vmax.xlane.f32.xlu0 %v622_v38 }
 0x87f   :  { %v753_v39 = vpop.xlane.xlu0 %752 }
 0x880   :  { %v754_v40 = vsel %vm583_vm1, %v753_v39, 0.0 }
 0x881   :  { %v755_v41 = vrot.slane %v754_v40, 4 }
 0x883   :  { %v756_v42 = vadd.f32 %v755_v41, %v754_v40  ;;  %v624_v43 = vpop.xlane.xlu0 %623 }
 0x884   :  { %v625_v44 = vsel %vm583_vm1, %v624_v43, -inf }
 0x885   :  { %v757_v45 = vrot.slane %v756_v42, 2  ;;  %v626_v46 = vrot.slane %v625_v44, 4 }
 0x887   :  { %v758_v47 = vadd.f32 %v757_v45, %v756_v42  ;;  %v627_v48 = vmax.f32 %v625_v44, %v626_v46 }
 0x889   :  { %v759_v49 = vrot.slane %v758_v47, 1  ;;  %v628_v50 = vrot.slane %v627_v48, 2 }
 0x88b   :  { %v760_v51 = vadd.f32 %v759_v49, %v758_v47  ;;  %v629_v53 = vmax.f32 %v627_v48, %v628_v50  ;;  %v612_v48 = vand.u32 2147483648, %v1802_v26 }
 0x88d   :  { %1460 = vlog2.f32 %v760_v51  ;;  %v630_v54 = vrot.slane %v629_v53, 1 }
 0x88f   :  { %v631_v55 = vmax.f32 %v629_v53, %v630_v54 }
 0x891   :  { %v632_v56 = vsub.f32 %v1154_v37, %v631_v55 }
 0x893   :  { %v633_v57 = vmul.f32 1.442695, %v632_v56 }
 0x895   :  { %1462 = vpow2.f32 %v633_v57 }
 0x897   :  { %v1461_v58 = vpop.eup %1460 }
 0x898   :  { %v762_v59 = vmul.f32 0.6931472, %v1461_v58 }
 0x89a   :  { %v763_v61 = vadd.f32 %v762_v59, %v743_v12 }
 0x89c   :  { %v764_v63 = vmax.f32 %v763_v61, 0.0 }
 0x89e   :  { %v765_v0 = vsub.f32 %v763_v61, %v764_v63  ;;  %v768_v1 = vsub.f32 0.0, %v764_v63 }
 0x89f   :  { %v1463_v2 = vpop.eup %1462 }
 0x8a0   :  { %v635_v16 = vsel %vm579_vm0, %v1463_v2, 0.0  ;;  %v766_v3 = vmul.f32 1.442695, %v765_v0  ;;  %v769_v4 = vmul.f32 1.442695, %v768_v1 }
 0x8a1   :  { %636 = vadd.xlane.f32.xlu0 %v635_v16 }
 0x8a2   :  { %1464 = vpow2.f32 %v766_v3 }
 0x8a3   :  { %1466 = vpow2.f32 %v769_v4 }
 0x8a4   :  { %1468 = vrsqrt.f32 %v1789_v52 }
 0x8ac   :  { %v1465_v5 = vpop.eup %1464 }
 0x8ad   :  { %v1467_v6 = vpop.eup %1466 }
 0x8ae   :  { %v1469_v7 = vpop.eup %1468  ;;  %v771_v8 = vadd.f32 %v1467_v6, %v1465_v5  ;;  %v45_v6 = vld [vmem:[%s1978_s1 + $0xc0] sm:$0xff] }
 0x8af   :  { %v719_v9 = vmul.f32 %v1469_v7, %v1789_v52  ;;  %v46_v7 = vld [vmem:[%s1978_s1 + $0xc8] sm:$0xff] }
 0x8b0   :  { %1470 = vlog2.f32 %v771_v8  ;;  %v1414_v8 = vpack.c.bf16 %v46_v7, %v45_v6 }
 0x8b1   :  { %v721_v10 = vsel %vm720_vm3, %v1789_v52, %v719_v9  ;;  %v47_v9 = vld [vmem:[%s1978_s1 + $0xd0] sm:$0xff]  ;;  %vm1126_vm3 = vcmask 1040384  }
 0x8b2   :  { %v724_v12 = vsel %vm722_vm4, %v723_v11, %v721_v10  ;;  %1415 = vmatpush3.bf16.msra.mxu1 %v1414_v8  ;;  %v48_v10 = vld [vmem:[%s1978_s1 + $0xd8] sm:$0xff]  ;;  %vm1131_vm4 = vcmask 35840  }
 0x8b3   :  { %v1093_v15 = vsel %vm1081_vm5, %v1781_v34, %v724_v12  ;;  %1416 = vmatprep.subr.bf16.mxu1 %v1531_v62  ;;  %v1417_v11 = vpack.c.bf16 %v48_v10, %v47_v9  ;;  %v49_v12 = vld [vmem:[%s1978_s1 + $0xe0] sm:$0xff] }
 0x8b4   :  { %v1094_v18 = vsel %vm1083_vm6, %v1093_v15, 128.0  ;;  %v51_v15 = vld [vmem:[%s1978_s1 + $0xf0] sm:$0xff] }
 0x8b6   :  { %1418 = vmatpush3.bf16.msra.mxu1 %v1417_v11 }
 0x8b7   :  { %1419 = vmatprep.subr.bf16.mxu1 %v1531_v62 }
 0x8ba   :  { %v1471_v13 = vpop.eup %1470 }
 0x8bb   :  { %v773_v14 = vmul.f32 0.6931472, %v1471_v13  ;;  %v50_v13 = vld [vmem:[%s1978_s1 + $0xe8] sm:$0xff] }
 0x8bd   :  { %v774_v17 = vadd.f32 %v773_v14, %v764_v63  ;;  %v1420_v14 = vpack.c.bf16 %v50_v13, %v49_v12 }
 0x8bf   :  { %v775_v19 = vsub.f32 %v774_v17, %v763_v61  ;;  %v1095_v20 = vsel %vm1085_vm7, %v1094_v18, %v774_v17  ;;  %1421 = vmatpush3.bf16.msra.mxu1 %v1420_v14  ;;  %v52_v17 = vld [vmem:[%s1978_s1 + $0xf8] sm:$0xff] }
 0x8c0   :  { %1422 = vmatprep.subr.bf16.mxu1 %v1531_v62  ;;  %v1423_v18 = vpack.c.bf16 %v52_v17, %v51_v15 }
 0x8c1   :  { %v776_v21 = vmul.f32 %v775_v19, %v1773_v22  ;;  %v1823_v52 = vsel %vm1087_vm8, %v1095_v20, %v775_v19  ;;  %v53_v19 = vld [vmem:[%s1978_s1 + $0x100] sm:$0xff]  ;;  %v54_v20 = vld [vmem:[%s1978_s1 + $0x108] sm:$0xff] }
 0x8c3   :  { %778 = vrot.lane.b32.xlu0 %v776_v21, %s1538_s9  ;;  %1424 = vmatpush3.bf16.msra.mxu1 %v1423_v18 }
 0x8c4   :  { %1425 = vmatprep.subr.bf16.mxu1 %v1531_v62 }
 0x92e   :  { %v637_v23 = vpop.xlane.xlu0 %636 }
 0x92f   :  { %v638_v24 = vsel %vm583_vm1, %v637_v23, 0.0  ;;  %v55_v23 = vld [vmem:[%s1978_s1 + $0x110] sm:$0xff] }
 0x930   :  { %v639_v25 = vrot.slane %v638_v24, 4 }
 0x932   :  { %v640_v34 = vadd.f32 %v639_v25, %v638_v24  ;;  %v56_v24 = vld [vmem:[%s1978_s1 + $0x118] sm:$0xff] }
 0x933   :  { %v1429_v25 = vpack.c.bf16 %v56_v24, %v55_v23 }
 0x934   :  { %v641_v27 = vrot.slane %v640_v34, 2 }
 0x935   :  { %v779_v28 = vpop.permute.xlu0 %778 }
 0x936   :  { %v642_v29 = vadd.f32 %v641_v27, %v640_v34  ;;  %v781_v30 = vsel %vm579_vm0, %v779_v28, 0.0  ;;  %v57_v34 = vld [vmem:[%s1978_s1 + $0x120] sm:$0xff]  ;;  %v58_v27 = vld [vmem:[%s1978_s1 + $0x128] sm:$0xff] }
 0x937   :  { %782 = vadd.xlane.f32.xlu1 %v781_v30  ;;  %v1432_v28 = vpack.c.bf16 %v58_v27, %v57_v34  ;;  %v60_v30 = vld [vmem:[%s1978_s1 + $0x138] sm:$0xff] }
 0x938   :  { %v643_v31 = vrot.slane %v642_v29, 1 }
 0x93a   :  { %v644_v32 = vadd.f32 %v643_v31, %v642_v29  ;;  %v59_v29 = vld [vmem:[%s1978_s1 + $0x130] sm:$0xff] }
 0x93b   :  { %v1435_v31 = vpack.c.bf16 %v60_v30, %v59_v29 }
 0x93c   :  { %1472 = vlog2.f32 %v644_v32 }
 0x946   :  { %v1473_v33 = vpop.eup %1472 }
 0x947   :  { %v646_v35 = vmul.f32 0.6931472, %v1473_v33 }
 0x949   :  { %v647_v36 = vadd.f32 %v646_v35, %v631_v55 }
 0x94b   :  { %v648_v37 = vmax.f32 %v647_v36, 0.0 }
 0x94d   :  { %v649_v38 = vsub.f32 %v647_v36, %v648_v37  ;;  %v652_v39 = vsub.f32 0.0, %v648_v37 }
 0x94f   :  { %v650_v40 = vmul.f32 1.442695, %v649_v38  ;;  %v653_v41 = vmul.f32 1.442695, %v652_v39  ;;  %v1156_v39 = vld [vmem:[%s1978_s1 + $0x193] ss:$0 sm:$0xff] }
 0x951   :  { %1474 = vpow2.f32 %v650_v40 }
 0x952   :  { %1476 = vpow2.f32 %v653_v41 }
 0x953   :  { %1478 = vrsqrt.f32 %v1802_v26 }
 0x95b   :  { %v1475_v42 = vpop.eup %1474 }
 0x95c   :  { %v1477_v43 = vpop.eup %1476 }
 0x95d   :  { %v1479_v44 = vpop.eup %1478  ;;  %v655_v45 = vadd.f32 %v1477_v43, %v1475_v42 }
 0x95e   :  { %v608_v46 = vmul.f32 %v1479_v44, %v1802_v26 }
 0x95f   :  { %1480 = vlog2.f32 %v655_v45 }
 0x960   :  { %v610_v47 = vsel %vm609_vm9, %v1802_v26, %v608_v46 }
 0x961   :  { %v613_v49 = vsel %vm611_vm10, %v612_v48, %v610_v47 }
 0x962   :  { %v1082_v53 = vsel %vm1081_vm5, %v1793_v60, %v613_v49 }
 0x963   :  { %v1084_v55 = vsel %vm1083_vm6, %v1082_v53, 128.0 }
 0x969   :  { %v1481_v50 = vpop.eup %1480 }
 0x96a   :  { %v657_v51 = vmul.f32 0.6931472, %v1481_v50 }
 0x96c   :  { %v658_v54 = vadd.f32 %v657_v51, %v648_v37  ;;  %v1155_v37 = vld [vmem:[%s1978_s1 + $0x192] ss:$0 sm:$0xff]  ;;  %v1158_v51 = vld [vmem:[%s1978_s1 + $0x194] ss:$0 sm:$0xff] }
 0x96e   :  { %v659_v56 = vsub.f32 %v658_v54, %v647_v36  ;;  %v1086_v57 = vsel %vm1085_vm7, %v1084_v55, %v658_v54 }
 0x970   :  { %v660_v58 = vmul.f32 %v659_v56, %v1773_v22  ;;  %v1840_v59 = vsel %vm1087_vm8, %v1086_v57, %v659_v56 }
 0x972   :  { %v661_v61 = vsel %vm579_vm0, %v660_v58, 0.0 }
 0x973   :  { %662 = vadd.xlane.f32.xlu0 %v661_v61 }
 0x9c4   :  { %v783_v26 = vpop.xlane.xlu1 %782 }
 0x9c5   :  { %v784_v63 = vmul.f32 0.015625, %v783_v26 }
 0x9c7   :  { %v1843_v0 = vsub.f32 %v776_v21, %v784_v63  ;;  %v1426_v21 = vpack.c.bf16 %v54_v20, %v53_v19 }
 0x9c9   :  { %v786_v60 = vmul.f32 %v1843_v0, %v1843_v0  ;;  %1427 = vmatpush3.bf16.msra.mxu1 %v1426_v21 }
 0x9ca   :  { %1428 = vmatprep.subr.bf16.mxu1 %v1531_v62 }
 0x9cb   :  { %788 = vrot.lane.b32.xlu1 %v786_v60, %s1538_s9  ;;  %s1540_s9 = smov 124  }
 0x9cd   :  { %1430 = vmatpush3.bf16.msra.mxu1 %v1429_v25 }
 0x9ce   :  { %1431 = vmatprep.subr.bf16.mxu1 %v1531_v62 }
 0x9d1   :  { %1433 = vmatpush3.bf16.msra.mxu1 %v1432_v28 }
 0x9d2   :  { %1434 = vmatprep.subr.bf16.mxu1 %v1531_v62 }
 0x9d5   :  { %1436 = vmatpush3.bf16.msra.mxu1 %v1435_v31 }
 0xa00   :  { %v663_v1 = vpop.xlane.xlu0 %662 }
 0xa01   :  { %v665_v2 = vmul.f32 0.015625, %v663_v1 }
 0xa03   :  { %v666_v16 = vsub.f32 %v660_v58, %v665_v2 }
 0xa05   :  { %v667_v3 = vmul.f32 %v666_v16, %v666_v16 }
 0xa07   :  { %v668_v22 = vsel %vm579_vm0, %v667_v3, 0.0 }
 0xa08   :  { %669 = vadd.xlane.f32.xlu0 %v668_v22 }
 0xa3d   :  { %v789_v4 = vpop.permute.xlu1 %788 }
 0xa3e   :  { %v791_v5 = vsel %vm579_vm0, %v789_v4, 0.0 }
 0xa3f   :  { %792 = vadd.xlane.f32.xlu1 %v791_v5 }
 0xa95   :  { %v670_v32 = vpop.xlane.xlu0 %669 }
 0xa96   :  { %v671_v33 = vmul.f32 0.015625, %v670_v32 }
 0xa98   :  { %v672_v35 = vadd.f32 1e-05, %v671_v33 }
 0xa9a   :  { %1482 = vrsqrt.f32 %v672_v35 }
 0xaa4   :  { %v1483_v36 = vpop.eup %1482 }
 0xaa5   :  { %v674_v38 = vmul.f32 %v1483_v36, %v666_v16 }
 0xaa7   :  { %v679_v40 = vmul.f32 %v1155_v37, %v674_v38 }
 0xaa9   :  { %v684_v41 = vadd.f32 %v1156_v39, %v679_v40 }
 0xaab   :  { %1484 = vtanh.f32 %v684_v41 }
 0xab5   :  { %v1485_v42 = vpop.eup %1484 }
 0xab6   :  { %801 = vst.msk [vmem:[#allocation5] sm:$0x3] %vm579_vm0, %v1485_v42 }
 0xacc   :  { %v793_v62 = vpop.xlane.xlu1 %792 }
 0xacd   :  { %v794_v43 = vmul.f32 0.015625, %v793_v62 }
 0xacf   :  { %v795_v44 = vadd.f32 1e-05, %v794_v43 }
 0xad1   :  { %1486 = vrsqrt.f32 %v795_v44 }
 0xadb   :  { %v1487_v45 = vpop.eup %1486 }
 0xadc   :  { %v797_v46 = vmul.f32 %v1487_v45, %v1843_v0 }
 0xade   :  { %v798_v47 = vmul.f32 %v1155_v37, %v797_v46 }
 0xae0   :  { %v799_v48 = vadd.f32 %v1156_v39, %v798_v47 }
 0xae2   :  { %1488 = vtanh.f32 %v799_v48 }
 0xaec   :  { %v1489_v49 = vpop.eup %1488 }
 0xaed   :  { %802 = vst.msk [vmem:[#allocation5] sm:$0x3] %vm733_vm2, %v1489_v49 }
 0xaf4   :  { %v803_v50 = vld [vmem:[#allocation5] sm:$0x3] }
 0xaf5   :  { %1357 = vmatmul.mubr.f32.vlgmr.msra.gmra.mrb[2].mxu1 %v803_v50 }
 0xbc8   :  { %v874_v53 = vpop.f32.mrb[2].mxu1 }
 0xbc9   :  { %v875_v54 = vadd.f32 %v1158_v51, %v874_v53  ;;  %v1358_v55 = vpop.f32.mrb[3].mxu1 }
 0xbcb   :  { %879 = vst.msk [vmem:[#allocation3] sm:$0x3] %vm878_vm11, %v875_v54 }
 0xbd2   :  { %v1918_v56 = vld [vmem:[#allocation3] sm:$0x3] }
 0xbd3   :  { %v882_v57 = vsel %vm881_vm12, %v1918_v56, 0.0  ;;  %v1000_v58 = vsel %vm999_vm13, %v1918_v56, 0.0 }
 0xbd4   :  { %v1001_v61 = vrot.slane %v1000_v58, 4  ;;  %883 = vadd.xlane.f32.xlu0 %v882_v57 }
 0xbd6   :  { %v1002_v26 = vadd.f32 %v1001_v61, %v1000_v58 }
 0xbd8   :  { %v1003_v63 = vrot.slane %v1002_v26, 2 }
 0xbda   :  { %v1004_v0 = vadd.f32 %v1003_v63, %v1002_v26 }
 0xbdc   :  { %v1005_v60 = vrot.slane %v1004_v0, 1 }
 0xbde   :  { %v1006_v1 = vadd.f32 %v1005_v60, %v1004_v0 }
 0xbe0   :  { %v1924_v2 = vmul.f32 0.5, %v1006_v1 }
 0xbe2   :  { %v1009_v16 = vsub.f32 %v1918_v56, %v1924_v2 }
 0xbe4   :  { %v1010_v3 = vmul.f32 %v1009_v16, %v1009_v16 }
 0xbe6   :  { %v1012_v22 = vsel %vm999_vm13, %v1010_v3, 0.0  ;;  %v1026_v15 = vmul.f32 -0.5, %v1010_v3 }
 0xbe7   :  { %v1013_v4 = vrot.slane %v1012_v22, 4 }
 0xbe9   :  { %v1014_v5 = vadd.f32 %v1013_v4, %v1012_v22 }
 0xbeb   :  { %v1015_v6 = vrot.slane %v1014_v5, 2 }
 0xbed   :  { %v1016_v7 = vadd.f32 %v1015_v6, %v1014_v5 }
 0xbef   :  { %v1017_v8 = vrot.slane %v1016_v7, 1 }
 0xbf1   :  { %v1018_v9 = vadd.f32 %v1017_v8, %v1016_v7 }
 0xbf3   :  { %1490 = vrsqrt.f32 %v1018_v9  ;;  %vm1021_vm14 = vcmp.eq.f32.partialorder %v1018_v9, inf  ;;  %v1024_v14 = vand.u32 2147483648, %v1018_v9  ;;  %vm1023_vm15 = vcmp.eq.f32.partialorder %v1018_v9, 0.0 }
 0xbf4   :  { %1492 = vrcp.f32 %v1018_v9 }
 0xbf5   :  { %1494 = vlog2.f32 %v1018_v9 }
 0xbfd   :  { %v1491_v10 = vpop.eup %1490 }
 0xbfe   :  { %v1493_v11 = vpop.eup %1492  ;;  %v1020_v12 = vmul.f32 %v1491_v10, %v1018_v9 }
 0xbff   :  { %v1495_v13 = vpop.eup %1494  ;;  %v1028_v20 = vmul.f32 %v1493_v11, %v1026_v15 }
 0xc00   :  { %v1022_v17 = vsel %vm1021_vm14, %v1018_v9, %v1020_v12  ;;  %v1030_v18 = vmul.f32 0.6931472, %v1495_v13 }
 0xc01   :  { %v1025_v19 = vsel %vm1023_vm15, %v1024_v14, %v1022_v17 }
 0xc02   :  { %1102 = vrot.lane.b32.xlu1 %v1025_v19, %s1539_s8  ;;  %v1031_v21 = vmul.f32 0.5, %v1030_v18 }
 0xc04   :  { %v1032_v23 = vsub.f32 %v1028_v20, %v1031_v21 }
 0xc06   :  { %v1162_v24 = vadd.f32 -0.9189385, %v1032_v23 }
 0xc08   :  { %v1034_v25 = vsel %vm999_vm13, %v1162_v24, -inf }
 0xc09   :  { %v1035_v34 = vrot.slane %v1034_v25, 4 }
 0xc0b   :  { %v1036_v27 = vmax.f32 %v1034_v25, %v1035_v34 }
 0xc0d   :  { %v1037_v28 = vrot.slane %v1036_v27, 2 }
 0xc0f   :  { %v1038_v29 = vmax.f32 %v1036_v27, %v1037_v28 }
 0xc11   :  { %v1039_v30 = vrot.slane %v1038_v29, 1 }
 0xc13   :  { %v1040_v31 = vmax.f32 %v1038_v29, %v1039_v30 }
 0xc15   :  { %v1041_v32 = vsub.f32 %v1162_v24, %v1040_v31 }
 0xc17   :  { %v1042_v33 = vmul.f32 1.442695, %v1041_v32 }
 0xc19   :  { %1496 = vpow2.f32 %v1042_v33 }
 0xc23   :  { %v1497_v35 = vpop.eup %1496 }
 0xc24   :  { %v1045_v36 = vsel %vm999_vm13, %v1497_v35, 0.0 }
 0xc25   :  { %v1046_v37 = vrot.slane %v1045_v36, 4 }
 0xc27   :  { %v1047_v38 = vadd.f32 %v1046_v37, %v1045_v36 }
 0xc29   :  { %v1048_v39 = vrot.slane %v1047_v38, 2 }
 0xc2b   :  { %v1049_v40 = vadd.f32 %v1048_v39, %v1047_v38 }
 0xc2d   :  { %v1050_v41 = vrot.slane %v1049_v40, 1 }
 0xc2f   :  { %v1051_v42 = vadd.f32 %v1050_v41, %v1049_v40 }
 0xc31   :  { %1498 = vlog2.f32 %v1051_v42 }
 0xc3b   :  { %v1499_v62 = vpop.eup %1498 }
 0xc3c   :  { %v1053_v43 = vmul.f32 0.6931472, %v1499_v62 }
 0xc3e   :  { %v1054_v44 = vadd.f32 %v1053_v43, %v1040_v31 }
 0xc40   :  { %v1055_v45 = vmax.f32 %v1054_v44, 0.0 }
 0xc42   :  { %v1056_v46 = vsub.f32 %v1054_v44, %v1055_v45  ;;  %v1059_v47 = vsub.f32 0.0, %v1055_v45 }
 0xc44   :  { %v1057_v48 = vmul.f32 1.442695, %v1056_v46  ;;  %v1060_v49 = vmul.f32 1.442695, %v1059_v47 }
 0xc46   :  { %1500 = vpow2.f32 %v1057_v48 }
 0xc47   :  { %1502 = vpow2.f32 %v1060_v49 }
 0xc50   :  { %v1501_v50 = vpop.eup %1500 }
 0xc51   :  { %v1503_v51 = vpop.eup %1502 }
 0xc52   :  { %v1062_v53 = vadd.f32 %v1503_v51, %v1501_v50 }
 0xc54   :  { %1504 = vlog2.f32 %v1062_v53 }
 0xc5e   :  { %v1505_v54 = vpop.eup %1504 }
 0xc5f   :  { %v1064_v55 = vmul.f32 0.6931472, %v1505_v54 }
 0xc61   :  { %v1065_v57 = vadd.f32 %v1064_v55, %v1055_v45  ;;  %v884_v58 = vpop.xlane.xlu0 %883 }
 0xc62   :  { %v885_v61 = vsel %vm583_vm1, %v884_v58, 0.0 }
 0xc63   :  { %1106 = vrot.lane.b32.xlu1 %v1065_v57, %s1540_s9  ;;  %v886_v26 = vrot.slane %v885_v61, 4  ;;  %v1932_v63 = vsub.f32 %v1065_v57, %v1054_v44 }
 0xc65   :  { %v887_v0 = vadd.f32 %v886_v26, %v885_v61 }
 0xc67   :  { %v888_v60 = vrot.slane %v887_v0, 2 }
 0xc69   :  { %v889_v1 = vadd.f32 %v888_v60, %v887_v0 }
 0xc6b   :  { %v890_v16 = vrot.slane %v889_v1, 1 }
 0xc6d   :  { %v891_v3 = vadd.f32 %v890_v16, %v889_v1 }
 0xc6f   :  { %v1934_v22 = vmul.f32 0.071428575, %v891_v3 }
 0xc71   :  { %v894_v4 = vsub.f32 %v1918_v56, %v1934_v22 }
 0xc73   :  { %v895_v5 = vmul.f32 %v894_v4, %v894_v4 }
 0xc75   :  { %v896_v6 = vsel %vm881_vm12, %v895_v5, 0.0  ;;  %v915_v19 = vmul.f32 -0.5, %v895_v5 }
 0xc76   :  { %897 = vadd.xlane.f32.xlu0 %v896_v6 }
 0xd03   :  { %v898_v7 = vpop.xlane.xlu0 %897 }
 0xd04   :  { %v899_v8 = vsel %vm583_vm1, %v898_v7, 0.0 }
 0xd05   :  { %v900_v9 = vrot.slane %v899_v8, 4 }
 0xd07   :  { %v901_v10 = vadd.f32 %v900_v9, %v899_v8 }
 0xd09   :  { %v902_v11 = vrot.slane %v901_v10, 2 }
 0xd0b   :  { %v903_v12 = vadd.f32 %v902_v11, %v901_v10 }
 0xd0d   :  { %v904_v13 = vrot.slane %v903_v12, 1 }
 0xd0f   :  { %v905_v14 = vadd.f32 %v904_v13, %v903_v12 }
 0xd11   :  { %v907_v15 = vmul.f32 0.07692308, %v905_v14  ;;  %v1121_v14 = vrot.slane %v1823_v52, 6  ;;  %v1160_v52 = vld [vmem:[%s1978_s1 + $0x195] ss:$0 sm:$0xff] }
 0xd13   :  { %1506 = vrcp.f32 %v907_v15  ;;  %vm910_vm0 = vcmp.eq.f32.partialorder %v907_v15, inf  ;;  %v913_v1 = vand.u32 2147483648, %v907_v15  ;;  %vm912_vm2 = vcmp.eq.f32.partialorder %v907_v15, 0.0 }
 0xd14   :  { %1508 = vlog2.f32 %v907_v15 }
 0xd1d   :  { %v1507_v17 = vpop.eup %1506 }
 0xd1e   :  { %v1509_v18 = vpop.eup %1508  ;;  %v917_v21 = vmul.f32 %v1507_v17, %v915_v19 }
 0xd1f   :  { %v919_v20 = vmul.f32 0.6931472, %v1509_v18 }
 0xd21   :  { %v920_v23 = vmul.f32 0.5, %v919_v20 }
 0xd23   :  { %v921_v24 = vsub.f32 %v917_v21, %v920_v23 }
 0xd25   :  { %v1159_v25 = vadd.f32 -0.9189385, %v921_v24 }
 0xd27   :  { %v923_v34 = vsel %vm881_vm12, %v1159_v25, -inf }
 0xd28   :  { %924 = vmax.xlane.f32.xlu0 %v923_v34 }
 0xdb5   :  { %v925_v27 = vpop.xlane.xlu0 %924 }
 0xdb6   :  { %v926_v28 = vsel %vm583_vm1, %v925_v27, -inf }
 0xdb7   :  { %v927_v29 = vrot.slane %v926_v28, 4 }
 0xdb9   :  { %v928_v30 = vmax.f32 %v926_v28, %v927_v29  ;;  %v1161_v28 = vld [vmem:[%s1978_s1 + $0x196] ss:$0 sm:$0xff] }
 0xdbb   :  { %v929_v31 = vrot.slane %v928_v30, 2 }
 0xdbd   :  { %v930_v32 = vmax.f32 %v928_v30, %v929_v31 }
 0xdbf   :  { %v931_v33 = vrot.slane %v930_v32, 1 }
 0xdc1   :  { %v932_v35 = vmax.f32 %v930_v32, %v931_v33 }
 0xdc3   :  { %v933_v36 = vsub.f32 %v1159_v25, %v932_v35 }
 0xdc5   :  { %v934_v37 = vmul.f32 1.442695, %v933_v36 }
 0xdc7   :  { %1510 = vpow2.f32 %v934_v37  ;;  %v1067_v37 = vmul.f32 %v1932_v63, %v1918_v56 }
 0xdd1   :  { %v1511_v38 = vpop.eup %1510 }
 0xdd2   :  { %v936_v39 = vsel %vm881_vm12, %v1511_v38, 0.0  ;;  %v1069_v38 = vsub.f32 %v1067_v37, %v1067_v37 }
 0xdd3   :  { %937 = vadd.xlane.f32.xlu0 %v936_v39 }
 0xdd4   :  { %v1070_v39 = vmul.f32 %v1069_v38, %v1069_v38 }
 0xe60   :  { %v938_v40 = vpop.xlane.xlu0 %937 }
 0xe61   :  { %v939_v41 = vsel %vm583_vm1, %v938_v40, 0.0  ;;  %v1072_v40 = vadd.f32 1e-05, %v1070_v39 }
 0xe62   :  { %v940_v42 = vrot.slane %v939_v41, 4 }
 0xe64   :  { %v941_v62 = vadd.f32 %v940_v42, %v939_v41 }
 0xe66   :  { %v942_v43 = vrot.slane %v941_v62, 2 }
 0xe68   :  { %v943_v44 = vadd.f32 %v942_v43, %v941_v62 }
 0xe6a   :  { %v944_v45 = vrot.slane %v943_v44, 1 }
 0xe6c   :  { %v945_v46 = vadd.f32 %v944_v45, %v943_v44 }
 0xe6e   :  { %1512 = vlog2.f32 %v945_v46 }
 0xe78   :  { %v1513_v47 = vpop.eup %1512 }
 0xe79   :  { %v947_v48 = vmul.f32 0.6931472, %v1513_v47 }
 0xe7b   :  { %v948_v49 = vadd.f32 %v947_v48, %v932_v35 }
 0xe7d   :  { %v949_v50 = vmax.f32 %v948_v49, 0.0 }
 0xe7f   :  { %v950_v51 = vsub.f32 %v948_v49, %v949_v50  ;;  %v953_v53 = vsub.f32 0.0, %v949_v50 }
 0xe81   :  { %v951_v54 = vmul.f32 1.442695, %v950_v51  ;;  %v954_v55 = vmul.f32 1.442695, %v953_v53 }
 0xe83   :  { %1514 = vpow2.f32 %v951_v54 }
 0xe84   :  { %1516 = vpow2.f32 %v954_v55 }
 0xe85   :  { %1518 = vrsqrt.f32 %v907_v15 }
 0xe8d   :  { %v1515_v57 = vpop.eup %1514 }
 0xe8e   :  { %v1517_v58 = vpop.eup %1516 }
 0xe8f   :  { %v1519_v61 = vpop.eup %1518  ;;  %v956_v26 = vadd.f32 %v1517_v58, %v1515_v57 }
 0xe90   :  { %v909_v0 = vmul.f32 %v1519_v61, %v907_v15 }
 0xe91   :  { %1520 = vlog2.f32 %v956_v26 }
 0xe92   :  { %v911_v60 = vsel %vm910_vm0, %v907_v15, %v909_v0 }
 0xe93   :  { %v914_v16 = vsel %vm912_vm2, %v913_v1, %v911_v60 }
 0xe94   :  { %v1089_v5 = vsel %vm1081_vm5, %v1934_v22, %v914_v16 }
 0xe95   :  { %v1090_v7 = vsel %vm1083_vm6, %v1089_v5, 14.0 }
 0xe9b   :  { %v1521_v3 = vpop.eup %1520 }
 0xe9c   :  { %v958_v4 = vmul.f32 0.6931472, %v1521_v3 }
 0xe9e   :  { %v959_v6 = vadd.f32 %v958_v4, %v949_v50 }
 0xea0   :  { %v960_v8 = vsub.f32 %v959_v6, %v948_v49  ;;  %v1091_v9 = vsel %vm1085_vm7, %v1090_v7, %v959_v6 }
 0xea2   :  { %v961_v10 = vmul.f32 %v960_v8, %v1918_v56  ;;  %v1092_v11 = vsel %vm1087_vm8, %v1091_v9, %v960_v8 }
 0xea3   :  { %v1118_v12 = vrot.slane %v1092_v11, 7 }
 0xea4   :  { %v962_v13 = vsel %vm881_vm12, %v961_v10, 0.0 }
 0xea5   :  { %963 = vadd.xlane.f32.xlu0 %v962_v13  ;;  %v1127_v15 = vsel %vm1126_vm3, %v1840_v59, %v1118_v12 }
 0xea6   :  { %v1128_v22 = vsel %vm583_vm1, %v1127_v15, %v1121_v14  ;;  %vm1129_vm1 = vcmask 1042432  }
 0xf32   :  { %v964_v17 = vpop.xlane.xlu0 %963 }
 0xf33   :  { %v966_v18 = vmul.f32 0.14285715, %v964_v17 }
 0xf35   :  { %v967_v19 = vsub.f32 %v961_v10, %v966_v18 }
 0xf37   :  { %v968_v20 = vmul.f32 %v967_v19, %v967_v19 }
 0xf39   :  { %v969_v21 = vsel %vm881_vm12, %v968_v20, 0.0 }
 0xf3a   :  { %970 = vadd.xlane.f32.xlu0 %v969_v21 }
 0xfc7   :  { %v971_v23 = vpop.xlane.xlu0 %970 }
 0xfc8   :  { %v972_v24 = vmul.f32 0.14285715, %v971_v23 }
 0xfca   :  { %v973_v25 = vadd.f32 1e-05, %v972_v24 }
 0xfcc   :  { %1522 = vrsqrt.f32 %v973_v25 }
 0xfd6   :  { %v1523_v34 = vpop.eup %1522 }
 0xfd7   :  { %v975_v27 = vmul.f32 %v1523_v34, %v967_v19 }
 0xfd9   :  { %v980_v59 = vmul.f32 %v1160_v52, %v975_v27 }
 0xfdb   :  { %v985_v29 = vadd.f32 %v1161_v28, %v980_v59 }
 0xfdd   :  { %v986_v30 = vsel %vm881_vm12, %v985_v29, -inf }
 0xfde   :  { %987 = vmax.xlane.f32.xlu0 %v986_v30 }
 0xff4   :  { %1098 = vrot.lane.b32.xlu0 %v1924_v2, %s1541_s3  ;;  %v1103_v2 = vpop.permute.xlu1 %1102 }
 0xff8   :  { %v1107_v45 = vpop.permute.xlu1 %1106 }
0x106b   :  { %v988_v31 = vpop.xlane.xlu0 %987 }
0x106c   :  { %v989_v32 = vsub.f32 %v985_v29, %v988_v31 }
0x106e   :  { %v990_v33 = vmul.f32 1.442695, %v989_v32 }
0x106f   :  { %v1099_v41 = vpop.permute.xlu0 %1098 }
0x1070   :  { %1524 = vpow2.f32 %v990_v33  ;;  %v1113_v42 = vsel %vm1081_vm5, %v1099_v41, %v1103_v2  ;;  %vm1078_vm5 = vcmask 56320  }
0x1071   :  { %1526 = vrsqrt.f32 %v1072_v40  ;;  %v1114_v43 = vsel %vm1083_vm6, %v1113_v42, 2.0 }
0x1072   :  { %v1115_v46 = vsel %vm1085_vm7, %v1114_v43, %v1107_v45 }
0x107a   :  { %v1525_v35 = vpop.eup %1524 }
0x107b   :  { %v992_v36 = vsel %vm881_vm12, %v1525_v35, 0.0  ;;  %v1527_v44 = vpop.eup %1526 }
0x107c   :  { %993 = vadd.xlane.f32.xlu0 %v992_v36 }
0x1092   :  { %1110 = vrot.lane.b32.xlu0 %v1932_v63, %s1542_s12  ;;  %v1074_v63 = vmul.f32 %v1527_v44, %v1069_v38 }
0x1094   :  { %v1075_v50 = vmul.f32 %v1160_v52, %v1074_v63 }
0x1096   :  { %v1076_v54 = vadd.f32 %v1161_v28, %v1075_v50 }
0x1109   :  { %v994_v62 = vpop.xlane.xlu0 %993 }
0x110a   :  { %1528 = vlog2.f32 %v994_v62 }
0x110d   :  { %v1111_v47 = vpop.permute.xlu0 %1110 }
0x110e   :  { %v1116_v56 = vsel %vm1087_vm8, %v1115_v46, %v1111_v47 }
0x110f   :  { %v1124_v48 = vrot.slane %v1116_v56, 5 }
0x1111   :  { %v1130_v49 = vsel %vm1129_vm1, %v1128_v22, %v1124_v48 }
0x1112   :  { %1132 = vst.msk [vmem:[%s1980_s2 + $0x2] sm:$0xf] %vm1131_vm4, %v1130_v49 }
0x1114   :  { %v1529_v51 = vpop.eup %1528 }
0x1115   :  { %v996_v53 = vmul.f32 0.6931472, %v1529_v51 }
0x1117   :  { %v997_v55 = vsub.f32 %v989_v32, %v996_v53 }
0x1119   :  { %v1079_v57 = vsel %vm1078_vm5, %v997_v55, %v1076_v54 }
0x111a   :  { %1080 = vst.msk [vmem:[%s1980_s2] sm:$0x3] %vm878_vm11, %v1079_v57 }

</bundles_post_ra>
